<compile_context>
chip_gen: v7x
topology: tpu7x:2x2x1
jax: 0.10.0
libtpu: 0.0.40
codegen_flags: <defaults>
</compile_context>

<pallas_src>
import jax
import jax.numpy as jnp
from jax import lax
from jax.experimental import pallas as pl
from jax.experimental.pallas import tpu as pltpu


# ----------------------------------------------------------------------------
# Fused kernel: whole batch resident in VMEM (total working set << 1 MiB).
# Layout is NCW: every (C, N) tile is (64, 128) -> lane-dense.
# ----------------------------------------------------------------------------
def _sa_layer_kernel(x_ref, m_ref, wv_ref, bv_ref, wt_ref, bt_ref,
                     gamma_ref, beta_ref, out_ref):
    B, C, N = x_ref.shape

    m = m_ref[...]          # (C, C)  bf16, = Wq^T Wq
    wv = wv_ref[...]        # (C, C)  bf16
    wt = wt_ref[...]        # (C, C)  bf16
    bv = bv_ref[...]        # (C, 1)  f32
    bt = bt_ref[...]        # (C, 1)  f32
    gamma = gamma_ref[...]  # (C, 1)  f32
    beta = beta_ref[...]    # (C, 1)  f32

    xs = []          # f32 per-batch inputs (for the residual)
    ts = []          # f32 per-batch trans_conv outputs
    s1 = jnp.zeros((C, 1), jnp.float32)   # BN one-pass stats: sum
    s2 = jnp.zeros((C, 1), jnp.float32)   # BN one-pass stats: sum of squares

    # -- per-batch attention + trans_conv (static unroll; B is tiny) ----------
    for b in range(B):
        x_b = x_ref[b]                        # (C, N) f32
        xb = x_b.astype(jnp.bfloat16)

        # energy[n, m] = q_n . q_m  with q = Wq x  ==  x^T (Wq^T Wq) x
        mx = jnp.dot(m, xb, preferred_element_type=jnp.float32)       # (C, N)
        energy = lax.dot_general(
            xb, mx.astype(jnp.bfloat16),
            (((0,), (0,)), ((), ())),
            preferred_element_type=jnp.float32)                       # (N, N)

        # softmax over last dim (EUP reciprocal instead of VALU divide)
        e = energy - jnp.max(energy, axis=-1, keepdims=True)
        p = jnp.exp(e)
        att = p * pl.reciprocal(jnp.sum(p, axis=-1, keepdims=True), approx=True)
        # attention / (1e-9 + attention.sum(dim=1, keepdim=True))  (column renorm)
        att = att * pl.reciprocal(1e-9 + jnp.sum(att, axis=0, keepdims=True),
                                  approx=True)

        # v = Wv x + bv ; x_r[c, m] = sum_n v[c, n] * att[n, m]
        v = jnp.dot(wv, xb, preferred_element_type=jnp.float32) + bv  # (C, N)
        x_r = jnp.dot(v.astype(jnp.bfloat16), att.astype(jnp.bfloat16),
                      preferred_element_type=jnp.float32)             # (C, N)

        d = (x_b - x_r).astype(jnp.bfloat16)
        t_b = jnp.dot(wt, d, preferred_element_type=jnp.float32) + bt # (C, N)

        xs.append(x_b)
        ts.append(t_b)
        s1 = s1 + jnp.sum(t_b, axis=1, keepdims=True)
        s2 = s2 + jnp.sum(t_b * t_b, axis=1, keepdims=True)

    # -- train-mode BatchNorm1d (batch stats over B and N) + ReLU + residual --
    cnt = float(B * N)
    mean = s1 / cnt                            # (C, 1)
    var = s2 / cnt - mean * mean               # biased variance, one pass
    scale = lax.rsqrt(var + 1e-5) * gamma      # (C, 1)

    for b in range(B):
        tn = (ts[b] - mean) * scale + beta     # (C, N)
        out_ref[b] = xs[b] + jnp.maximum(tn, 0.0)


# ----------------------------------------------------------------------------
# Wrapper: PyTorch layout (B, C, N) in and out, no transposes.
# ----------------------------------------------------------------------------
def sa_layer_forward(x, params):
    """x: (B, C, N) float32 -> (B, C, N) float32 (matches PyTorch SA_Layer)."""
    Wq, Wv, bv, Wt, bt, gamma, beta = params
    B, C, N = x.shape

    # Fold the shared q/k projection: energy = x^T (Wq^T Wq) x.
    M = jnp.dot(Wq.T, Wq).astype(jnp.bfloat16)       # (C, C)
    wv16 = Wv.astype(jnp.bfloat16)
    wt16 = Wt.astype(jnp.bfloat16)
    bv2 = bv.reshape(C, 1).astype(jnp.float32)
    bt2 = bt.reshape(C, 1).astype(jnp.float32)
    g2 = gamma.reshape(C, 1).astype(jnp.float32)
    b2 = beta.reshape(C, 1).astype(jnp.float32)

    vmem = pl.BlockSpec(memory_space=pltpu.MemorySpace.VMEM)
    return pl.pallas_call(
        _sa_layer_kernel,
        out_shape=jax.ShapeDtypeStruct((B, C, N), jnp.float32),
        in_specs=[vmem] * 8,
        out_specs=vmem,
    )(x.astype(jnp.float32), M, wv16, bv2, wt16, bt2, g2, b2)


# ----------------------------------------------------------------------------
# Pure-JAX reference (mirrors the PyTorch forward, NCW layout, f32)
# ----------------------------------------------------------------------------
def sa_layer_reference(x, params):
    Wq, Wv, bv, Wt, bt, gamma, beta = params
    q = jnp.einsum('dc,bcn->bdn', Wq, x)                      # (B, C/4, N)
    x_q = jnp.transpose(q, (0, 2, 1))                         # (B, N, C/4)
    x_k = q                                                   # shared weights
    x_v = jnp.einsum('dc,bcn->bdn', Wv, x) + bv[None, :, None]
    energy = jnp.einsum('bnd,bdm->bnm', x_q, x_k)             # (B, N, N)
    attention = jax.nn.softmax(energy, axis=-1)
    attention = attention / (1e-9 + attention.sum(axis=1, keepdims=True))
    x_r = jnp.einsum('bcn,bnm->bcm', x_v, attention)          # (B, C, N)
    d = x - x_r
    t = jnp.einsum('dc,bcn->bdn', Wt, d) + bt[None, :, None]
    mean = t.mean(axis=(0, 2), keepdims=True)                 # train-mode BN
    var = ((t - mean) ** 2).mean(axis=(0, 2), keepdims=True)
    tn = (t - mean) / jnp.sqrt(var + 1e-5) * gamma[None, :, None] + beta[None, :, None]
    return x + jnp.maximum(tn, 0.0)


if __name__ == "__main__":
    B, C, N = 2, 64, 128

    key = jax.random.PRNGKey(0)
    kx, kq, kv, kvb, kt, ktb = jax.random.split(key, 6)

    # Deterministic parameter init (PyTorch-like uniform bound 1/sqrt(fan_in)).
    bound = 1.0 / (C ** 0.5)
    Wq = jax.random.uniform(kq, (C // 4, C), jnp.float32, -bound, bound)  # shared q/k
    Wv = jax.random.uniform(kv, (C, C), jnp.float32, -bound, bound)
    bv = jax.random.uniform(kvb, (C,), jnp.float32, -bound, bound)
    Wt = jax.random.uniform(kt, (C, C), jnp.float32, -bound, bound)
    bt = jax.random.uniform(ktb, (C,), jnp.float32, -bound, bound)
    gamma = jnp.ones((C,), jnp.float32)   # BatchNorm1d default init
    beta = jnp.zeros((C,), jnp.float32)
    params = (Wq, Wv, bv, Wt, bt, gamma, beta)

    x = jax.random.normal(kx, (B, C, N), jnp.float32)

    out = jax.block_until_ready(sa_layer_forward(x, params))
    ref = sa_layer_reference(x, params)

    assert out.shape == x.shape and out.dtype == jnp.float32
    max_err = float(jnp.max(jnp.abs(out - ref)))
    assert jnp.allclose(out, ref, atol=5e-2, rtol=5e-2), f"max_err={max_err}"
    print("KERNEL_OK")
</pallas_src>

<mosaic_0001>
module attributes {stable_mosaic.version = 11 : i64} {
  func.func @_sa_layer_kernel(%arg0: memref<2x64x128xf32, #tpu.memory_space<vmem>>, %arg1: memref<64x64xbf16, #tpu.memory_space<vmem>>, %arg2: memref<64x64xbf16, #tpu.memory_space<vmem>>, %arg3: memref<64x1xf32, #tpu.memory_space<vmem>>, %arg4: memref<64x64xbf16, #tpu.memory_space<vmem>>, %arg5: memref<64x1xf32, #tpu.memory_space<vmem>>, %arg6: memref<64x1xf32, #tpu.memory_space<vmem>>, %arg7: memref<64x1xf32, #tpu.memory_space<vmem>>, %arg8: memref<2x64x128xf32, #tpu.memory_space<vmem>>) attributes {dimension_semantics = [], scalar_prefetch = 0 : i64, scratch_operands = 0 : i64, tpu.core_type = #tpu.core_type<tc>} {
    %c0 = arith.constant 0 : index
    %c0_0 = arith.constant 0 : index
    %0 = vector.load %arg1[%c0, %c0_0] : memref<64x64xbf16, #tpu.memory_space<vmem>>, vector<64x64xbf16>
    %c0_1 = arith.constant 0 : index
    %c0_2 = arith.constant 0 : index
    %1 = vector.load %arg2[%c0_1, %c0_2] : memref<64x64xbf16, #tpu.memory_space<vmem>>, vector<64x64xbf16>
    %c0_3 = arith.constant 0 : index
    %c0_4 = arith.constant 0 : index
    %2 = vector.load %arg4[%c0_3, %c0_4] : memref<64x64xbf16, #tpu.memory_space<vmem>>, vector<64x64xbf16>
    %c0_5 = arith.constant 0 : index
    %c0_6 = arith.constant 0 : index
    %3 = vector.load %arg3[%c0_5, %c0_6] : memref<64x1xf32, #tpu.memory_space<vmem>>, vector<64x1xf32>
    %c0_7 = arith.constant 0 : index
    %c0_8 = arith.constant 0 : index
    %4 = vector.load %arg5[%c0_7, %c0_8] : memref<64x1xf32, #tpu.memory_space<vmem>>, vector<64x1xf32>
    %c0_9 = arith.constant 0 : index
    %c0_10 = arith.constant 0 : index
    %5 = vector.load %arg6[%c0_9, %c0_10] : memref<64x1xf32, #tpu.memory_space<vmem>>, vector<64x1xf32>
    %c0_11 = arith.constant 0 : index
    %c0_12 = arith.constant 0 : index
    %6 = vector.load %arg7[%c0_11, %c0_12] : memref<64x1xf32, #tpu.memory_space<vmem>>, vector<64x1xf32>
    %cst = arith.constant 0.000000e+00 : f32
    %7 = vector.broadcast %cst : f32 to vector<64x1xf32>
    %cst_13 = arith.constant 0.000000e+00 : f32
    %8 = vector.broadcast %cst_13 : f32 to vector<64x1xf32>
    %c0_14 = arith.constant 0 : index
    %c0_15 = arith.constant 0 : index
    %c0_16 = arith.constant 0 : index
    %9 = vector.load %arg0[%c0_14, %c0_15, %c0_16] : memref<2x64x128xf32, #tpu.memory_space<vmem>>, vector<1x64x128xf32>
    %10 = vector.shape_cast %9 : vector<1x64x128xf32> to vector<64x128xf32>
    %11 = arith.truncf %10 : vector<64x128xf32> to vector<64x128xbf16>
    %cst_17 = arith.constant dense<0.000000e+00> : vector<64x128xf32>
    %12 = tpu.matmul %0, %11, %cst_17 {dimension_numbers = #tpu.dot_dimension_numbers<[1], [0], [0], [1], [0, 0, 1, 1], [], []>} : vector<64x64xbf16>, vector<64x128xbf16>, vector<64x128xf32> -> vector<64x128xf32>
    %13 = arith.truncf %12 : vector<64x128xf32> to vector<64x128xbf16>
    %cst_18 = arith.constant dense<0.000000e+00> : vector<128x128xf32>
    %14 = tpu.matmul %11, %13, %cst_18 {dimension_numbers = #tpu.dot_dimension_numbers<[0], [0], [1], [1], [0, 1, 1, 1], [], []>} : vector<64x128xbf16>, vector<64x128xbf16>, vector<128x128xf32> -> vector<128x128xf32>
    %cst_19 = arith.constant dense<0xFF800000> : vector<128xf32>
    %15 = vector.multi_reduction <maximumf>, %14, %cst_19 [1] : vector<128x128xf32> to vector<128xf32>
    %16 = vector.shape_cast %15 : vector<128xf32> to vector<128x1xf32>
    %17 = vector.broadcast %16 : vector<128x1xf32> to vector<128x128xf32>
    %18 = arith.subf %14, %17 : vector<128x128xf32>
    %19 = math.exp %18 : vector<128x128xf32>
    %cst_20 = arith.constant dense<0.000000e+00> : vector<128xf32>
    %20 = vector.multi_reduction <add>, %19, %cst_20 [1] : vector<128x128xf32> to vector<128xf32>
    %21 = vector.shape_cast %20 : vector<128xf32> to vector<128x1xf32>
    %22 = tpu.reciprocal %21 {approx = true} : vector<128x1xf32> -> vector<128x1xf32>
    %23 = vector.broadcast %22 : vector<128x1xf32> to vector<128x128xf32>
    %24 = arith.mulf %19, %23 : vector<128x128xf32>
    %cst_21 = arith.constant dense<0.000000e+00> : vector<128xf32>
    %25 = vector.multi_reduction <add>, %24, %cst_21 [0] : vector<128x128xf32> to vector<128xf32>
    %26 = vector.shape_cast %25 : vector<128xf32> to vector<1x128xf32>
    %cst_22 = arith.constant 9.99999971E-10 : f32
    %27 = vector.broadcast %cst_22 : f32 to vector<1x128xf32>
    %28 = arith.addf %27, %26 : vector<1x128xf32>
    %29 = tpu.reciprocal %28 {approx = true} : vector<1x128xf32> -> vector<1x128xf32>
    %30 = vector.broadcast %29 : vector<1x128xf32> to vector<128x128xf32>
    %31 = arith.mulf %24, %30 : vector<128x128xf32>
    %cst_23 = arith.constant dense<0.000000e+00> : vector<64x128xf32>
    %32 = tpu.matmul %1, %11, %cst_23 {dimension_numbers = #tpu.dot_dimension_numbers<[1], [0], [0], [1], [0, 0, 1, 1], [], []>} : vector<64x64xbf16>, vector<64x128xbf16>, vector<64x128xf32> -> vector<64x128xf32>
    %33 = vector.broadcast %3 : vector<64x1xf32> to vector<64x128xf32>
    %34 = arith.addf %32, %33 : vector<64x128xf32>
    %35 = arith.truncf %34 : vector<64x128xf32> to vector<64x128xbf16>
    %36 = arith.truncf %31 : vector<128x128xf32> to vector<128x128xbf16>
    %cst_24 = arith.constant dense<0.000000e+00> : vector<64x128xf32>
    %37 = tpu.matmul %35, %36, %cst_24 {dimension_numbers = #tpu.dot_dimension_numbers<[1], [0], [0], [1], [0, 0, 1, 1], [], []>} : vector<64x128xbf16>, vector<128x128xbf16>, vector<64x128xf32> -> vector<64x128xf32>
    %38 = arith.subf %10, %37 : vector<64x128xf32>
    %39 = arith.truncf %38 : vector<64x128xf32> to vector<64x128xbf16>
    %cst_25 = arith.constant dense<0.000000e+00> : vector<64x128xf32>
    %40 = tpu.matmul %2, %39, %cst_25 {dimension_numbers = #tpu.dot_dimension_numbers<[1], [0], [0], [1], [0, 0, 1, 1], [], []>} : vector<64x64xbf16>, vector<64x128xbf16>, vector<64x128xf32> -> vector<64x128xf32>
    %41 = vector.broadcast %4 : vector<64x1xf32> to vector<64x128xf32>
    %42 = arith.addf %40, %41 : vector<64x128xf32>
    %cst_26 = arith.constant dense<0.000000e+00> : vector<64xf32>
    %43 = vector.multi_reduction <add>, %42, %cst_26 [1] : vector<64x128xf32> to vector<64xf32>
    %44 = vector.shape_cast %43 : vector<64xf32> to vector<64x1xf32>
    %45 = arith.addf %7, %44 : vector<64x1xf32>
    %46 = arith.mulf %42, %42 : vector<64x128xf32>
    %cst_27 = arith.constant dense<0.000000e+00> : vector<64xf32>
    %47 = vector.multi_reduction <add>, %46, %cst_27 [1] : vector<64x128xf32> to vector<64xf32>
    %48 = vector.shape_cast %47 : vector<64xf32> to vector<64x1xf32>
    %49 = arith.addf %8, %48 : vector<64x1xf32>
    %c1 = arith.constant 1 : index
    %c0_28 = arith.constant 0 : index
    %c0_29 = arith.constant 0 : index
    %50 = vector.load %arg0[%c1, %c0_28, %c0_29] : memref<2x64x128xf32, #tpu.memory_space<vmem>>, vector<1x64x128xf32>
    %51 = vector.shape_cast %50 : vector<1x64x128xf32> to vector<64x128xf32>
    %52 = arith.truncf %51 : vector<64x128xf32> to vector<64x128xbf16>
    %cst_30 = arith.constant dense<0.000000e+00> : vector<64x128xf32>
    %53 = tpu.matmul %0, %52, %cst_30 {dimension_numbers = #tpu.dot_dimension_numbers<[1], [0], [0], [1], [0, 0, 1, 1], [], []>} : vector<64x64xbf16>, vector<64x128xbf16>, vector<64x128xf32> -> vector<64x128xf32>
    %54 = arith.truncf %53 : vector<64x128xf32> to vector<64x128xbf16>
    %cst_31 = arith.constant dense<0.000000e+00> : vector<128x128xf32>
    %55 = tpu.matmul %52, %54, %cst_31 {dimension_numbers = #tpu.dot_dimension_numbers<[0], [0], [1], [1], [0, 1, 1, 1], [], []>} : vector<64x128xbf16>, vector<64x128xbf16>, vector<128x128xf32> -> vector<128x128xf32>
    %cst_32 = arith.constant dense<0xFF800000> : vector<128xf32>
    %56 = vector.multi_reduction <maximumf>, %55, %cst_32 [1] : vector<128x128xf32> to vector<128xf32>
    %57 = vector.shape_cast %56 : vector<128xf32> to vector<128x1xf32>
    %58 = vector.broadcast %57 : vector<128x1xf32> to vector<128x128xf32>
    %59 = arith.subf %55, %58 : vector<128x128xf32>
    %60 = math.exp %59 : vector<128x128xf32>
    %cst_33 = arith.constant dense<0.000000e+00> : vector<128xf32>
    %61 = vector.multi_reduction <add>, %60, %cst_33 [1] : vector<128x128xf32> to vector<128xf32>
    %62 = vector.shape_cast %61 : vector<128xf32> to vector<128x1xf32>
    %63 = tpu.reciprocal %62 {approx = true} : vector<128x1xf32> -> vector<128x1xf32>
    %64 = vector.broadcast %63 : vector<128x1xf32> to vector<128x128xf32>
    %65 = arith.mulf %60, %64 : vector<128x128xf32>
    %cst_34 = arith.constant dense<0.000000e+00> : vector<128xf32>
    %66 = vector.multi_reduction <add>, %65, %cst_34 [0] : vector<128x128xf32> to vector<128xf32>
    %67 = vector.shape_cast %66 : vector<128xf32> to vector<1x128xf32>
    %cst_35 = arith.constant 9.99999971E-10 : f32
    %68 = vector.broadcast %cst_35 : f32 to vector<1x128xf32>
    %69 = arith.addf %68, %67 : vector<1x128xf32>
    %70 = tpu.reciprocal %69 {approx = true} : vector<1x128xf32> -> vector<1x128xf32>
    %71 = vector.broadcast %70 : vector<1x128xf32> to vector<128x128xf32>
    %72 = arith.mulf %65, %71 : vector<128x128xf32>
    %cst_36 = arith.constant dense<0.000000e+00> : vector<64x128xf32>
    %73 = tpu.matmul %1, %52, %cst_36 {dimension_numbers = #tpu.dot_dimension_numbers<[1], [0], [0], [1], [0, 0, 1, 1], [], []>} : vector<64x64xbf16>, vector<64x128xbf16>, vector<64x128xf32> -> vector<64x128xf32>
    %74 = vector.broadcast %3 : vector<64x1xf32> to vector<64x128xf32>
    %75 = arith.addf %73, %74 : vector<64x128xf32>
    %76 = arith.truncf %75 : vector<64x128xf32> to vector<64x128xbf16>
    %77 = arith.truncf %72 : vector<128x128xf32> to vector<128x128xbf16>
    %cst_37 = arith.constant dense<0.000000e+00> : vector<64x128xf32>
    %78 = tpu.matmul %76, %77, %cst_37 {dimension_numbers = #tpu.dot_dimension_numbers<[1], [0], [0], [1], [0, 0, 1, 1], [], []>} : vector<64x128xbf16>, vector<128x128xbf16>, vector<64x128xf32> -> vector<64x128xf32>
    %79 = arith.subf %51, %78 : vector<64x128xf32>
    %80 = arith.truncf %79 : vector<64x128xf32> to vector<64x128xbf16>
    %cst_38 = arith.constant dense<0.000000e+00> : vector<64x128xf32>
    %81 = tpu.matmul %2, %80, %cst_38 {dimension_numbers = #tpu.dot_dimension_numbers<[1], [0], [0], [1], [0, 0, 1, 1], [], []>} : vector<64x64xbf16>, vector<64x128xbf16>, vector<64x128xf32> -> vector<64x128xf32>
    %82 = vector.broadcast %4 : vector<64x1xf32> to vector<64x128xf32>
    %83 = arith.addf %81, %82 : vector<64x128xf32>
    %cst_39 = arith.constant dense<0.000000e+00> : vector<64xf32>
    %84 = vector.multi_reduction <add>, %83, %cst_39 [1] : vector<64x128xf32> to vector<64xf32>
    %85 = vector.shape_cast %84 : vector<64xf32> to vector<64x1xf32>
    %86 = arith.addf %45, %85 : vector<64x1xf32>
    %87 = arith.mulf %83, %83 : vector<64x128xf32>
    %cst_40 = arith.constant dense<0.000000e+00> : vector<64xf32>
    %88 = vector.multi_reduction <add>, %87, %cst_40 [1] : vector<64x128xf32> to vector<64xf32>
    %89 = vector.shape_cast %88 : vector<64xf32> to vector<64x1xf32>
    %90 = arith.addf %49, %89 : vector<64x1xf32>
    %cst_41 = arith.constant 2.560000e+02 : f32
    %91 = vector.broadcast %cst_41 : f32 to vector<64x1xf32>
    %92 = arith.divf %86, %91 : vector<64x1xf32>
    %cst_42 = arith.constant 2.560000e+02 : f32
    %93 = vector.broadcast %cst_42 : f32 to vector<64x1xf32>
    %94 = arith.divf %90, %93 : vector<64x1xf32>
    %95 = arith.mulf %92, %92 : vector<64x1xf32>
    %96 = arith.subf %94, %95 : vector<64x1xf32>
    %cst_43 = arith.constant 9.99999974E-6 : f32
    %97 = vector.broadcast %cst_43 : f32 to vector<64x1xf32>
    %98 = arith.addf %96, %97 : vector<64x1xf32>
    %99 = math.rsqrt %98 : vector<64x1xf32>
    %100 = arith.mulf %99, %5 : vector<64x1xf32>
    %101 = vector.broadcast %92 : vector<64x1xf32> to vector<64x128xf32>
    %102 = arith.subf %42, %101 : vector<64x128xf32>
    %103 = vector.broadcast %100 : vector<64x1xf32> to vector<64x128xf32>
    %104 = arith.mulf %102, %103 : vector<64x128xf32>
    %105 = vector.broadcast %6 : vector<64x1xf32> to vector<64x128xf32>
    %106 = arith.addf %104, %105 : vector<64x128xf32>
    %cst_44 = arith.constant 0.000000e+00 : f32
    %107 = vector.broadcast %cst_44 : f32 to vector<64x128xf32>
    %108 = arith.maximumf %106, %107 : vector<64x128xf32>
    %109 = arith.addf %10, %108 : vector<64x128xf32>
    %c0_45 = arith.constant 0 : index
    %c0_46 = arith.constant 0 : index
    %c0_47 = arith.constant 0 : index
    %110 = vector.load %arg8[%c0_45, %c0_46, %c0_47] : memref<2x64x128xf32, #tpu.memory_space<vmem>>, vector<1x64x128xf32>
    %111 = vector.shape_cast %110 : vector<1x64x128xf32> to vector<64x128xf32>
    %112 = vector.shape_cast %109 : vector<64x128xf32> to vector<1x64x128xf32>
    tpu.vector_store %arg8[%c0_45, %c0_46, %c0_47], %112 {strides = array<i32>} : memref<2x64x128xf32, #tpu.memory_space<vmem>>, vector<1x64x128xf32>,
    %113 = vector.broadcast %92 : vector<64x1xf32> to vector<64x128xf32>
    %114 = arith.subf %83, %113 : vector<64x128xf32>
    %115 = vector.broadcast %100 : vector<64x1xf32> to vector<64x128xf32>
    %116 = arith.mulf %114, %115 : vector<64x128xf32>
    %117 = vector.broadcast %6 : vector<64x1xf32> to vector<64x128xf32>
    %118 = arith.addf %116, %117 : vector<64x128xf32>
    %cst_48 = arith.constant 0.000000e+00 : f32
    %119 = vector.broadcast %cst_48 : f32 to vector<64x128xf32>
    %120 = arith.maximumf %118, %119 : vector<64x128xf32>
    %121 = arith.addf %51, %120 : vector<64x128xf32>
    %c1_49 = arith.constant 1 : index
    %c0_50 = arith.constant 0 : index
    %c0_51 = arith.constant 0 : index
    %122 = vector.load %arg8[%c1_49, %c0_50, %c0_51] : memref<2x64x128xf32, #tpu.memory_space<vmem>>, vector<1x64x128xf32>
    %123 = vector.shape_cast %122 : vector<1x64x128xf32> to vector<64x128xf32>
    %124 = vector.shape_cast %121 : vector<64x128xf32> to vector<1x64x128xf32>
    tpu.vector_store %arg8[%c1_49, %c0_50, %c0_51], %124 {strides = array<i32>} : memref<2x64x128xf32, #tpu.memory_space<vmem>>, vector<1x64x128xf32>,
    return
  }
}

</mosaic_0001>

<bundles_post_ra>
// kernel: tpu_custom_call.1
= control target key start
LH: loop header
LB: loop body
LE: loop exit
PB: predicated region body
PF: predicated region fallthrough
CT: control target
= control target key end

     0   :  { %vm119_vm0 = vcmask 523264   ;;  %s3481_s0 = inlined_call_operand.vmem [shape: f32[2,64,128], index: 0, kind: input, shape index: {}]   ;;  %s3482_s1 = inlined_call_operand.vmem [shape: bf16[64,64], index: 1, kind: input, shape index: {}]   ;;  %s3483_s2 = inlined_call_operand.vmem [shape: bf16[64,64], index: 2, kind: input, shape index: {}]   ;;  %s3484_s3 = inlined_call_operand.vmem [shape: f32[64,1], index: 3, kind: input, shape index: {}]   ;;  %s3485_s4 = inlined_call_operand.vmem [shape: bf16[64,64], index: 4, kind: input, shape index: {}]   ;;  %s3486_s5 = inlined_call_operand.vmem [shape: f32[64,1], index: 5, kind: input, shape index: {}]   ;;  %s3487_s6 = inlined_call_operand.vmem [shape: f32[64,1], index: 6, kind: input, shape index: {}]   ;;  %s3488_s7 = inlined_call_operand.vmem [shape: f32[64,1], index: 7, kind: input, shape index: {}]   ;;  %s3489_s8 = inlined_call_operand.hbm [shape: f32[2,64,128], index: 8, kind: output, shape index: {}]  }
   0x1   :  { %v2473_v0 = vld [vmem:[%s3481_s0] sm:$0xff]  ;;  %v2478_v1 = vld [vmem:[%s3481_s0 + $0x8] sm:$0xff]  ;;  %v2483_v2 = vld [vmem:[%s3481_s0 + $0x10] sm:$0xff] }
   0x2   :  { %v95_v3 = vpack.c.bf16 %v2478_v1, %v2473_v0  ;;  %v2490_v4 = vld [vmem:[%s3481_s0 + $0x18] sm:$0xff]  ;;  %v2497_v6 = vld [vmem:[%s3481_s0 + $0x20] sm:$0xff]  ;;  %v2502_v7 = vld [vmem:[%s3481_s0 + $0x28] sm:$0xff] }
   0x3   :  { %v96_v5 = vpack.c.bf16 %v2490_v4, %v2483_v2  ;;  %v2507_v8 = vld [vmem:[%s3482_s1] sm:$0xff]   ;;  %v97_v9 = vpack.c.bf16 %v2502_v7, %v2497_v6  ;;  %v2514_v10 = vld [vmem:[%s3481_s0 + $0x30] sm:$0xff]  ;;  %v2521_v11 = vld [vmem:[%s3481_s0 + $0x38] sm:$0xff] }
   0x4   :  { %2023 = vmatprep.subr.bf16.mxu0 %v95_v3  ;;  %201 = vxpose.xlu0.c.b16.start [1/4] (short) %v95_v3, 128  ;;  %v98_v12 = vpack.c.bf16 %v2521_v11, %v2514_v10 }
   0x5   :  { %2024 = vmatpush3.bf16.msra.mxu0 %v95_v3  ;;  %2031 = vmatprep.mubr.msk.bf16.mxu0 %vm119_vm0, %v2507_v8 }
   0x6   :  { %2025 = vmatprep.subr.bf16.mxu0 %v96_v5 }
   0x8   :  { %202 = vxpose.xlu0.c.b16.cont [2/4] (short) %v96_v5, 128 }
   0x9   :  { %2026 = vmatpush3.bf16.msra.mxu0 %v96_v5 }
   0xa   :  { %2027 = vmatprep.subr.bf16.mxu0 %v97_v9 }
   0xc   :  { %203 = vxpose.xlu0.c.b16.cont [3/4] (short) %v97_v9, 128 }
   0xd   :  { %2028 = vmatpush3.bf16.msra.mxu0 %v97_v9 }
   0xe   :  { %13 = vsyncpa [#allocation3], 0  ;;  %2029 = vmatprep.subr.bf16.mxu0 %v98_v12  ;;  %v2528_v13 = vld [vmem:[%s3482_s1 + $0x8] sm:$0xff]   ;;  %v2533_v14 = vld [vmem:[%s3482_s1 + $0x10] sm:$0xff]   ;;  %v2421_v56 = vmov 0  }
   0xf   :  { %v2542_v15 = vld [vmem:[%s3482_s1 + $0x18] sm:$0xff]   ;;  %v2587_v52 = vld [vmem:[%s3483_s2] sm:$0xff]   ;;  %v2592_v53 = vld [vmem:[%s3483_s2 + $0x8] sm:$0xff]   ;;  %2219 = vset.pattern.permute.xlu1 %v2421_v56 }
  0x10   :  { %204 = vxpose.xlu0.c.b16.end [4/4] (short) %v98_v12, 128  ;;  %v2601_v54 = vld [vmem:[%s3483_s2 + $0x10] sm:$0xff]   ;;  %v2606_v55 = vld [vmem:[%s3483_s2 + $0x18] sm:$0xff]  }
  0x11   :  { %2030 = vmatpush3.bf16.msra.mxu0 %v98_v12 }
  0x12   :  { %2063 = vmatprep.subr.bf16.mxu0 %v95_v3 }
  0x14   :  { %2032 = vmatmul.mubr.msk.bf16.vlgmr.msra.gmra.mrb[0].mxu0 %vm119_vm0, %v2528_v13 }
  0x15   :  { %2035 = vmatprep.mubr.msk.bf16.mxu0 %vm119_vm0, %v2533_v14  ;;  %2064 = vmatpush3.bf16.msra.mxu0 %v95_v3 }
  0x16   :  { %2065 = vmatprep.subr.bf16.mxu0 %v96_v5 }
  0x19   :  { %2066 = vmatpush3.bf16.msra.mxu0 %v96_v5  ;;  %2220 = vset.pattern.permute.xlu0 %v2421_v56 }
  0x1a   :  { %2067 = vmatprep.subr.bf16.mxu0 %v97_v9 }
  0x1c   :  { %2036 = vmatmul.mubr.msk.bf16.gmra.mrb[4].mxu0 %vm119_vm0, %v2542_v15 }
  0x1d   :  { %2068 = vmatpush3.bf16.msra.mxu0 %v97_v9  ;;  %2071 = vmatprep.mubr.msk.bf16.mxu0 %vm119_vm0, %v2587_v52 }
  0x1e   :  { %2069 = vmatprep.subr.bf16.mxu0 %v98_v12 }
  0x21   :  { %2070 = vmatpush3.bf16.msra.mxu0 %v98_v12 }
  0x24   :  { %2072 = vmatmul.mubr.msk.bf16.vlgmr.msra.gmra.mrb[8].mxu0 %vm119_vm0, %v2592_v53 }
  0x25   :  { %2075 = vmatprep.mubr.msk.bf16.mxu0 %vm119_vm0, %v2601_v54 }
  0x2c   :  { %2076 = vmatmul.mubr.msk.bf16.gmra.mrb[12].mxu0 %vm119_vm0, %v2606_v55 }
  0x6a   :  { %v209_v16 = vpop.trf.xlu0 }
  0x6b   :  { %2047 = vmatprep.mubr.msk.bf16.mxu1 %vm119_vm0, %v209_v16 }
  0x6e   :  { %v210_v23 = vpop.trf.xlu0 }
  0x72   :  { %v211_v30 = vpop.trf.xlu0 }
  0x76   :  { %v212_v31 = vpop.trf.xlu0 }
  0x7a   :  { %v213_v32 = vpop.trf.xlu0 }
  0x7e   :  { %v214_v33 = vpop.trf.xlu0 }
  0x82   :  { %v215_v34 = vpop.trf.xlu0 }
  0x86   :  { %v216_v35 = vpop.trf.xlu0 }
  0xe7   :  { %v2033_v17 = vpop.f32.mrb[0].mxu0 }
  0xe8   :  { %v166_v18 = vpop.f32.mrb[1].mxu0 }
  0xe9   :  { %v2034_v19 = vpop.f32.mrb[2].mxu0 }
  0xea   :  { %v198_v20 = vpack.c.bf16 %v2034_v19, %v2033_v17  ;;  %v169_v21 = vpop.f32.mrb[3].mxu0 }
  0xeb   :  { %v197_v22 = vpack.c.bf16 %v169_v21, %v166_v18 }
  0xed   :  { %2039 = vmatprep.subr.bf16.mxu1 %v197_v22 }
  0xee   :  { %2040 = vmatpush3.bf16.msra.mxu1 %v197_v22 }
  0xef   :  { %v2037_v24 = vpop.f32.mrb[4].mxu0  ;;  %2041 = vmatprep.subr.bf16.mxu1 %v198_v20 }
  0xf0   :  { %v182_v25 = vpop.f32.mrb[5].mxu0 }
  0xf1   :  { %v2038_v26 = vpop.f32.mrb[6].mxu0 }
  0xf2   :  { %v200_v27 = vpack.c.bf16 %v2038_v26, %v2037_v24  ;;  %v185_v28 = vpop.f32.mrb[7].mxu0  ;;  %2042 = vmatpush3.bf16.msra.mxu1 %v198_v20 }
  0xf3   :  { %v199_v29 = vpack.c.bf16 %v185_v28, %v182_v25 }
  0xf5   :  { %2043 = vmatprep.subr.bf16.mxu1 %v199_v29 }
  0xf6   :  { %2044 = vmatpush3.bf16.msra.mxu1 %v199_v29 }
  0xf7   :  { %2045 = vmatprep.subr.bf16.mxu1 %v200_v27 }
  0xfa   :  { %2046 = vmatpush3.bf16.msra.mxu1 %v200_v27 }
  0xfd   :  { %2048 = vmatmul.mubr.msk.bf16.vlgmr.msra.gmra.mrb[0].mxu1 %vm119_vm0, %v210_v23 }
  0xfe   :  { %2051 = vmatprep.mubr.msk.bf16.mxu1 %vm119_vm0, %v211_v30 }
 0x105   :  { %2052 = vmatmul.mubr.msk.bf16.gmra.mrb[4].mxu1 %vm119_vm0, %v212_v31 }
 0x106   :  { %2055 = vmatprep.mubr.msk.bf16.mxu1 %vm119_vm0, %v213_v32 }
 0x10d   :  { %2056 = vmatmul.mubr.msk.bf16.gmra.mrb[8].mxu1 %vm119_vm0, %v214_v33 }
 0x10e   :  { %2059 = vmatprep.mubr.msk.bf16.mxu1 %vm119_vm0, %v215_v34 }
 0x115   :  { %2060 = vmatmul.mubr.msk.bf16.gmra.mrb[12].mxu1 %vm119_vm0, %v216_v35 }
 0x1d0   :  { %v2049_v36 = vpop.f32.mrb[0].mxu1 }
 0x1d1   :  { %342 = vmax.xlane.f32.xlu1 %v2049_v36  ;;  %v275_v37 = vpop.f32.mrb[1].mxu1 }
 0x1d2   :  { %v2050_v38 = vpop.f32.mrb[2].mxu1 }
 0x1d3   :  { %v278_v39 = vpop.f32.mrb[3].mxu1 }
 0x1d5   :  { %338 = vmax.xlane.f32.xlu1 %v275_v37 }
 0x1d8   :  { %v2053_v40 = vpop.f32.mrb[4].mxu1 }
 0x1d9   :  { %344 = vmax.xlane.f32.xlu1 %v2050_v38  ;;  %v291_v41 = vpop.f32.mrb[5].mxu1 }
 0x1da   :  { %346 = vmax.xlane.f32.xlu0 %v291_v41  ;;  %v2554_v42 = vpop.f32.mrb[6].mxu1 }
 0x1db   :  { %v2556_v43 = vpop.f32.mrb[7].mxu1 }
 0x1dd   :  { %340 = vmax.xlane.f32.xlu1 %v278_v39 }
 0x1e0   :  { %v2558_v44 = vpop.f32.mrb[8].mxu1 }
 0x1e1   :  { %350 = vmax.xlane.f32.xlu1 %v2053_v40  ;;  %v2560_v45 = vpop.f32.mrb[9].mxu1 }
 0x1e2   :  { %v2562_v46 = vpop.f32.mrb[10].mxu1 }
 0x1e3   :  { %v2564_v47 = vpop.f32.mrb[11].mxu1 }
 0x1e5   :  { %352 = vmax.xlane.f32.xlu1 %v2554_v42 }
 0x1e8   :  { %v2567_v48 = vpop.f32.mrb[12].mxu1 }
 0x1e9   :  { %348 = vmax.xlane.f32.xlu1 %v2556_v43  ;;  %v2570_v49 = vpop.f32.mrb[13].mxu1 }
 0x1ea   :  { %v2572_v50 = vpop.f32.mrb[14].mxu1 }
 0x1eb   :  { %v2574_v51 = vpop.f32.mrb[15].mxu1 }
 0x1ec   :  { %364 = vmax.xlane.f32.xlu0 %v2574_v51 }
 0x1ed   :  { %358 = vmax.xlane.f32.xlu1 %v2558_v44 }
 0x1f0   :  { %368 = vmax.xlane.f32.xlu0 %v2572_v50 }
 0x1f1   :  { %354 = vmax.xlane.f32.xlu1 %v2560_v45 }
 0x1f5   :  { %356 = vmax.xlane.f32.xlu1 %v2564_v47 }
 0x1f9   :  { %360 = vmax.xlane.f32.xlu1 %v2562_v46 }
 0x1fd   :  { %362 = vmax.xlane.f32.xlu1 %v2570_v49 }
 0x201   :  { %366 = vmax.xlane.f32.xlu1 %v2567_v48 }
 0x25e   :  { %v343_v57 = vpop.xlane.xlu1 %342 }
 0x25f   :  { %v372_v59 = vsub.f32 %v2049_v36, %v343_v57 }
 0x261   :  { %v390_v63 = vmul.f32 1.442695, %v372_v59 }
 0x262   :  { %v339_v58 = vpop.xlane.xlu1 %338 }
 0x263   :  { %v370_v60 = vsub.f32 %v275_v37, %v339_v58 }
 0x265   :  { %v386_v61 = vmul.f32 1.442695, %v370_v60 }
 0x266   :  { %v345_v62 = vpop.xlane.xlu1 %344 }
 0x267   :  { %2233 = vpow2.f32 %v386_v61  ;;  %v347_v3 = vpop.xlane.xlu0 %346  ;;  %v373_v9 = vsub.f32 %v2050_v38, %v345_v62 }
 0x268   :  { %v374_v5 = vsub.f32 %v291_v41, %v347_v3  ;;  %2235 = vpow2.f32 %v390_v63 }
 0x269   :  { %v392_v19 = vmul.f32 1.442695, %v373_v9 }
 0x26a   :  { %v394_v12 = vmul.f32 1.442695, %v374_v5  ;;  %v341_v16 = vpop.xlane.xlu1 %340 }
 0x26b   :  { %v371_v17 = vsub.f32 %v278_v39, %v341_v16 }
 0x26c   :  { %2237 = vpow2.f32 %v394_v12 }
 0x26d   :  { %v388_v18 = vmul.f32 1.442695, %v371_v17 }
 0x26e   :  { %v351_v20 = vpop.xlane.xlu1 %350 }
 0x26f   :  { %2239 = vpow2.f32 %v388_v18  ;;  %v376_v21 = vsub.f32 %v2053_v40, %v351_v20 }
 0x270   :  { %2241 = vpow2.f32 %v392_v19 }
 0x271   :  { %v2612_v22 = vpop.eup %2233  ;;  %v398_v23 = vmul.f32 1.442695, %v376_v21  ;;  %v55_v21 = vld [vmem:[%s3484_s3] sm:$0xff] }
 0x272   :  { %v353_v24 = vpop.xlane.xlu1 %352  ;;  %418 = vadd.xlane.f32.xlu1 %v2612_v22  ;;  %v2615_v25 = vpop.eup %2235 }
 0x273   :  { %2243 = vpow2.f32 %v398_v23  ;;  %v377_v27 = vsub.f32 %v2554_v42, %v353_v24  ;;  %v57_v23 = vld [vmem:[%s3484_s3 + $0x10] sm:$0xff]  ;;  %v56_v24 = vld [vmem:[%s3484_s3 + $0x8] sm:$0xff] }
 0x275   :  { %v400_v33 = vmul.f32 1.442695, %v377_v27  ;;  %v59_v27 = vld [vmem:[%s3484_s3 + $0x20] sm:$0xff] }
 0x276   :  { %v349_v26 = vpop.xlane.xlu1 %348  ;;  %422 = vadd.xlane.f32.xlu1 %v2615_v25  ;;  %v2620_v29 = vpop.eup %2237 }
 0x277   :  { %v375_v28 = vsub.f32 %v2556_v43, %v349_v26  ;;  %v58_v26 = vld [vmem:[%s3484_s3 + $0x18] sm:$0xff] }
 0x279   :  { %v2622_v30 = vpop.eup %2239  ;;  %v396_v31 = vmul.f32 1.442695, %v375_v28  ;;  %v365_v39 = vpop.xlane.xlu0 %364  ;;  %v60_v28 = vld [vmem:[%s3484_s3 + $0x28] sm:$0xff] }
 0x27a   :  { %v359_v32 = vpop.xlane.xlu1 %358  ;;  %426 = vadd.xlane.f32.xlu1 %v2620_v29  ;;  %420 = vadd.xlane.f32.xlu0 %v2622_v30  ;;  %v2626_v34 = vpop.eup %2241 }
 0x27b   :  { %2245 = vpow2.f32 %v396_v31  ;;  %v380_v36 = vsub.f32 %v2558_v44, %v359_v32  ;;  %v383_v44 = vsub.f32 %v2574_v51, %v365_v39  ;;  %v61_v31 = vld [vmem:[%s3484_s3 + $0x30] sm:$0xff]  ;;  %v62_v32 = vld [vmem:[%s3484_s3 + $0x38] sm:$0xff] }
 0x27c   :  { %2247 = vpow2.f32 %v400_v33  ;;  %v2694_v33 = vpop.f32.mrb[8].mxu0 }
 0x27d   :  { %v2628_v35 = vpop.eup %2243  ;;  %v406_v41 = vmul.f32 1.442695, %v380_v36  ;;  %v369_v59 = vpop.xlane.xlu0 %368  ;;  %v412_v62 = vmul.f32 1.442695, %v383_v44 }
 0x27e   :  { %v355_v37 = vpop.xlane.xlu1 %354  ;;  %430 = vadd.xlane.f32.xlu1 %v2628_v35  ;;  %424 = vadd.xlane.f32.xlu0 %v2626_v34  ;;  %v385_v63 = vsub.f32 %v2572_v50, %v369_v59  ;;  %v2696_v36 = vpop.f32.mrb[9].mxu0 }
 0x27f   :  { %v378_v38 = vsub.f32 %v2560_v45, %v355_v37  ;;  %v2698_v37 = vpop.f32.mrb[10].mxu0 }
 0x280   :  { %v416_v9 = vmul.f32 1.442695, %v385_v63 }
 0x281   :  { %v402_v40 = vmul.f32 1.442695, %v378_v38  ;;  %v2700_v38 = vpop.f32.mrb[11].mxu0 }
 0x282   :  { %v357_v42 = vpop.xlane.xlu1 %356  ;;  %v2702_v39 = vpop.f32.mrb[12].mxu0 }
 0x283   :  { %2249 = vpow2.f32 %v402_v40  ;;  %v379_v43 = vsub.f32 %v2564_v47, %v357_v42  ;;  %v2704_v40 = vpop.f32.mrb[13].mxu0 }
 0x284   :  { %2251 = vpow2.f32 %v406_v41  ;;  %v2706_v41 = vpop.f32.mrb[14].mxu0 }
 0x285   :  { %v2635_v56 = vpop.eup %2245  ;;  %v404_v57 = vmul.f32 1.442695, %v379_v43  ;;  %v2708_v42 = vpop.f32.mrb[15].mxu0 }
 0x286   :  { %v361_v58 = vpop.xlane.xlu1 %360  ;;  %428 = vadd.xlane.f32.xlu0 %v2635_v56  ;;  %v2640_v60 = vpop.eup %2247 }
 0x287   :  { %2253 = vpow2.f32 %v404_v57  ;;  %v381_v45 = vsub.f32 %v2562_v46, %v361_v58 }
 0x289   :  { %v408_v61 = vmul.f32 1.442695, %v381_v45 }
 0x28a   :  { %v363_v47 = vpop.xlane.xlu1 %362  ;;  %432 = vadd.xlane.f32.xlu0 %v2640_v60 }
 0x28b   :  { %2255 = vpow2.f32 %v408_v61  ;;  %v382_v51 = vsub.f32 %v2570_v49, %v363_v47 }
 0x28c   :  { %2257 = vpow2.f32 %v412_v62 }
 0x28d   :  { %v2645_v3 = vpop.eup %2249  ;;  %v410_v5 = vmul.f32 1.442695, %v382_v51 }
 0x28e   :  { %434 = vadd.xlane.f32.xlu1 %v2645_v3  ;;  %v367_v46 = vpop.xlane.xlu1 %366  ;;  %v2649_v16 = vpop.eup %2251 }
 0x28f   :  { %2259 = vpow2.f32 %v410_v5  ;;  %v384_v12 = vsub.f32 %v2567_v48, %v367_v46 }
 0x290   :  { %2261 = vpow2.f32 %v416_v9 }
 0x291   :  { %v2651_v50 = vpop.eup %2253  ;;  %v414_v17 = vmul.f32 1.442695, %v384_v12 }
 0x292   :  { %438 = vadd.xlane.f32.xlu1 %v2649_v16  ;;  %436 = vadd.xlane.f32.xlu0 %v2651_v50 }
 0x293   :  { %2263 = vpow2.f32 %v414_v17 }
 0x295   :  { %v2655_v49 = vpop.eup %2255 }
 0x296   :  { %440 = vadd.xlane.f32.xlu0 %v2655_v49  ;;  %v2658_v18 = vpop.eup %2257 }
 0x299   :  { %v2660_v19 = vpop.eup %2259 }
 0x29a   :  { %442 = vadd.xlane.f32.xlu1 %v2660_v19  ;;  %444 = vadd.xlane.f32.xlu0 %v2658_v18  ;;  %v2664_v48 = vpop.eup %2261 }
 0x29d   :  { %v2666_v20 = vpop.eup %2263 }
 0x29e   :  { %446 = vadd.xlane.f32.xlu1 %v2666_v20  ;;  %448 = vadd.xlane.f32.xlu0 %v2664_v48 }
 0x2af   :  { %523 = vperm.xlu1 %2219, %v55_v21  }
 0x2b3   :  { %533 = vperm.xlu1 %2219, %v57_v23  }
 0x2b4   :  { %528 = vperm.xlu0 %2220, %v56_v24  }
 0x2b7   :  { %538 = vperm.xlu1 %2219, %v58_v26  }
 0x2bb   :  { %543 = vperm.xlu1 %2219, %v59_v27  }
 0x2bf   :  { %548 = vperm.xlu1 %2219, %v60_v28  }
 0x2c3   :  { %553 = vperm.xlu1 %2219, %v61_v31  }
 0x2c7   :  { %558 = vperm.xlu1 %2219, %v62_v32  }
 0x2ff   :  { %v419_v43 = vpop.xlane.xlu1 %418 }
 0x300   :  { %2265 = vrcp.f32 %v419_v43 }
 0x303   :  { %v423_v57 = vpop.xlane.xlu1 %422 }
 0x304   :  { %2267 = vrcp.f32 %v423_v57 }
 0x307   :  { %v421_v44 = vpop.xlane.xlu0 %420  ;;  %v427_v59 = vpop.xlane.xlu1 %426 }
 0x308   :  { %2269 = vrcp.f32 %v421_v44 }
 0x30a   :  { %v2266_v45 = vpop.eup %2265 }
 0x30b   :  { %v425_v58 = vpop.xlane.xlu0 %424  ;;  %v431_v47 = vpop.xlane.xlu1 %430  ;;  %v2711_v51 = vmul.f32 %v2266_v45, %v2612_v22 }
 0x30c   :  { %2271 = vrcp.f32 %v425_v58 }
 0x30d   :  { %2273 = vrcp.f32 %v427_v59 }
 0x30e   :  { %v2268_v61 = vpop.eup %2267 }
 0x30f   :  { %v2717_v9 = vmul.f32 %v2268_v61, %v2615_v25 }
 0x312   :  { %v2270_v62 = vpop.eup %2269 }
 0x313   :  { %v429_v63 = vpop.xlane.xlu0 %428  ;;  %v2714_v5 = vmul.f32 %v2270_v62, %v2622_v30 }
 0x314   :  { %2275 = vrcp.f32 %v429_v63 }
 0x315   :  { %v482_v46 = vadd.f32 %v2714_v5, %v2711_v51  ;;  %2277 = vrcp.f32 %v431_v47 }
 0x316   :  { %v2272_v12 = vpop.eup %2271 }
 0x317   :  { %v433_v17 = vpop.xlane.xlu0 %432  ;;  %v2722_v21 = vmul.f32 %v2272_v12, %v2626_v34  ;;  %v483_v23 = vadd.f32 %v482_v46, %v2717_v9  ;;  %v2274_v22 = vpop.eup %2273 }
 0x318   :  { %2279 = vrcp.f32 %v433_v17  ;;  %v2727_v25 = vmul.f32 %v2274_v22, %v2620_v29 }
 0x319   :  { %v484_v30 = vadd.f32 %v483_v23, %v2722_v21 }
 0x31b   :  { %v435_v24 = vpop.xlane.xlu1 %434  ;;  %v485_v34 = vadd.f32 %v484_v30, %v2727_v25 }
 0x31c   :  { %2281 = vrcp.f32 %v435_v24 }
 0x31e   :  { %v2276_v26 = vpop.eup %2275 }
 0x31f   :  { %v2730_v27 = vmul.f32 %v2276_v26, %v2635_v56  ;;  %v439_v28 = vpop.xlane.xlu1 %438  ;;  %v437_v31 = vpop.xlane.xlu0 %436 }
 0x320   :  { %2283 = vrcp.f32 %v439_v28  ;;  %v2278_v32 = vpop.eup %2277 }
 0x321   :  { %2285 = vrcp.f32 %v437_v31  ;;  %v486_v43 = vadd.f32 %v485_v34, %v2730_v27  ;;  %v2735_v58 = vmul.f32 %v2278_v32, %v2628_v35 }
 0x322   :  { %v2280_v57 = vpop.eup %2279 }
 0x323   :  { %v441_v44 = vpop.xlane.xlu0 %440  ;;  %v2738_v59 = vmul.f32 %v2280_v57, %v2640_v60  ;;  %v487_v56 = vadd.f32 %v486_v43, %v2735_v58 }
 0x324   :  { %2287 = vrcp.f32 %v441_v44 }
 0x325   :  { %v488_v47 = vadd.f32 %v487_v56, %v2738_v59 }
 0x326   :  { %v2282_v29 = vpop.eup %2281 }
 0x327   :  { %v443_v45 = vpop.xlane.xlu1 %442  ;;  %v445_v61 = vpop.xlane.xlu0 %444  ;;  %v2742_v62 = vmul.f32 %v2282_v29, %v2645_v3 }
 0x328   :  { %2289 = vrcp.f32 %v443_v45 }
 0x329   :  { %2291 = vrcp.f32 %v445_v61  ;;  %v489_v60 = vadd.f32 %v488_v47, %v2742_v62 }
 0x32a   :  { %v2284_v63 = vpop.eup %2283 }
 0x32b   :  { %v2286_v46 = vpop.eup %2285  ;;  %v447_v35 = vpop.xlane.xlu1 %446  ;;  %v2750_v22 = vmul.f32 %v2284_v63, %v2649_v16 }
 0x32c   :  { %v449_v12 = vpop.xlane.xlu0 %448  ;;  %v2746_v17 = vmul.f32 %v2286_v46, %v2651_v50  ;;  %2293 = vrcp.f32 %v447_v35 }
 0x32d   :  { %2295 = vrcp.f32 %v449_v12 }
 0x32e   :  { %v2288_v23 = vpop.eup %2287  ;;  %v490_v3 = vadd.f32 %v489_v60, %v2746_v17 }
 0x32f   :  { %v2754_v24 = vmul.f32 %v2288_v23, %v2655_v49  ;;  %v2756_v30 = vpop.permute.xlu1 %523 }
 0x330   :  { %v491_v26 = vadd.f32 %v490_v3, %v2750_v22  ;;  %v628_v50 = vadd.f32 %v2696_v36, %v2756_v30 }
 0x332   :  { %v2290_v28 = vpop.eup %2289  ;;  %v492_v16 = vadd.f32 %v491_v26, %v2754_v24 }
 0x333   :  { %v2292_v31 = vpop.eup %2291  ;;  %v2762_v34 = vmul.f32 %v2290_v28, %v2660_v19  ;;  %v2764_v32 = vpop.permute.xlu1 %533 }
 0x334   :  { %v2767_v43 = vpop.permute.xlu0 %528  ;;  %v479_v57 = vmul.f32 %v2292_v31, %v2658_v18  ;;  %v2775_v36 = vadd.f32 %v2694_v33, %v2764_v32 }
 0x335   :  { %v631_v49 = vadd.f32 %v2700_v38, %v2767_v43  ;;  %v493_v44 = vadd.f32 %v492_v16, %v2762_v34 }
 0x336   :  { %v2294_v29 = vpop.eup %2293 }
 0x337   :  { %v658_v19 = vpack.c.bf16 %v631_v49, %v628_v50  ;;  %v2296_v56 = vpop.eup %2295  ;;  %v480_v45 = vmul.f32 %v2294_v29, %v2666_v20  ;;  %v2778_v61 = vpop.permute.xlu1 %538  ;;  %v494_v63 = vadd.f32 %v493_v44, %v479_v57 }
 0x338   :  { %v2782_v47 = vadd.f32 %v2698_v37, %v2778_v61  ;;  %v481_v18 = vmul.f32 %v2296_v56, %v2664_v48 }
 0x339   :  { %2095 = vmatprep.mubr.bf16.mxu1 %v658_v19  ;;  %v495_v38 = vadd.f32 %v494_v63, %v480_v45 }
 0x33a   :  { %v659_v46 = vpack.c.bf16 %v2782_v47, %v2775_v36 }
 0x33b   :  { %v2787_v33 = vpop.permute.xlu1 %543  ;;  %v496_v35 = vadd.f32 %v495_v38, %v481_v18 }
 0x33c   :  { %v644_v20 = vadd.f32 %v2704_v40, %v2787_v33 }
 0x33d   :  { %v497_v12 = vrot.slane %v496_v35, 4 }
 0x33f   :  { %v498_v60 = vadd.f32 %v497_v12, %v496_v35  ;;  %v2791_v23 = vpop.permute.xlu1 %548 }
 0x340   :  { %v647_v37 = vadd.f32 %v2708_v42, %v2791_v23 }
 0x341   :  { %v499_v3 = vrot.slane %v498_v60, 2 }
 0x342   :  { %v660_v26 = vpack.c.bf16 %v647_v37, %v644_v20 }
 0x343   :  { %v500_v48 = vadd.f32 %v499_v3, %v498_v60  ;;  %v2795_v28 = vpop.permute.xlu1 %553 }
 0x344   :  { %v652_v31 = vadd.f32 %v2702_v39, %v2795_v28 }
 0x345   :  { %v501_v50 = vrot.slane %v500_v48, 1 }
 0x347   :  { %v502_v16 = vadd.f32 %v501_v50, %v500_v48  ;;  %v2799_v49 = vpop.permute.xlu1 %558  ;;  %v2855_v48 = vld [vmem:[%s3481_s0 + $0x68] sm:$0xff] }
 0x348   :  { %v655_v40 = vadd.f32 %v2706_v41, %v2799_v49 }
 0x349   :  { %v503_v44 = vadd.f32 1e-09, %v502_v16  ;;  %v2867_v16 = vld [vmem:[%s3481_s0 + $0x78] sm:$0xff] }
 0x34a   :  { %v661_v29 = vpack.c.bf16 %v655_v40, %v652_v31  ;;  %v2862_v31 = vld [vmem:[%s3481_s0 + $0x70] sm:$0xff] }
 0x34b   :  { %2297 = vrcp.f32 %v503_v44  ;;  %v952_v40 = vpack.c.bf16 %v2867_v16, %v2862_v31 }
 0x355   :  { %v2298_v36 = vpop.eup %2297 }
 0x356   :  { %v505_v42 = vmul.f32 %v2298_v36, %v2711_v51  ;;  %v506_v19 = vmul.f32 %v2298_v36, %v2714_v5  ;;  %v507_v56 = vmul.f32 %v2298_v36, %v2717_v9  ;;  %v508_v63 = vmul.f32 %v2298_v36, %v2722_v21 }
 0x357   :  { %v509_v38 = vmul.f32 %v2298_v36, %v2727_v25  ;;  %v510_v35 = vmul.f32 %v2298_v36, %v2730_v27  ;;  %v511_v12 = vmul.f32 %v2298_v36, %v2735_v58  ;;  %v512_v51 = vmul.f32 %v2298_v36, %v2738_v59 }
 0x358   :  { %v662_v47 = vpack.c.bf16 %v506_v19, %v505_v42  ;;  %v663_v39 = vpack.c.bf16 %v508_v63, %v507_v56  ;;  %v513_v9 = vmul.f32 %v2298_v36, %v2742_v62  ;;  %v514_v21 = vmul.f32 %v2298_v36, %v2746_v17 }
 0x359   :  { %v664_v41 = vpack.c.bf16 %v510_v35, %v509_v38  ;;  %v665_v5 = vpack.c.bf16 %v512_v51, %v511_v12  ;;  %v515_v25 = vmul.f32 %v2298_v36, %v2750_v22  ;;  %v516_v27 = vmul.f32 %v2298_v36, %v2754_v24  ;;  %v2819_v22 = vld [vmem:[%s3485_s4] sm:$0xff]  }
 0x35a   :  { %2079 = vmatprep.subr.bf16.mxu1 %v662_v47  ;;  %v666_v20 = vpack.c.bf16 %v514_v21, %v513_v9  ;;  %v517_v58 = vmul.f32 %v2298_v36, %v2762_v34  ;;  %v518_v59 = vmul.f32 %v2298_v36, %v479_v57  ;;  %v519_v3 = vmul.f32 %v2298_v36, %v480_v45  ;;  %v2826_v24 = vld [vmem:[%s3481_s0 + $0x40] sm:$0xff]  ;;  %v2831_v34 = vld [vmem:[%s3481_s0 + $0x48] sm:$0xff]  ;;  %v2838_v45 = vld [vmem:[%s3481_s0 + $0x50] sm:$0xff] }
 0x35b   :  { %2080 = vmatpush3.bf16.msra.mxu1 %v662_v47  ;;  %v667_v60 = vpack.c.bf16 %v516_v27, %v515_v25  ;;  %v520_v62 = vmul.f32 %v2298_v36, %v481_v18  ;;  %2111 = vmatprep.mubr.msk.bf16.mxu0 %vm119_vm0, %v2819_v22  ;;  %v949_v57 = vpack.c.bf16 %v2831_v34, %v2826_v24  ;;  %v2843_v18 = vld [vmem:[%s3481_s0 + $0x58] sm:$0xff]  ;;  %v2882_v21 = vld [vmem:[%s3485_s4 + $0x8] sm:$0xff]  }
 0x35c   :  { %2081 = vmatprep.subr.bf16.mxu1 %v663_v39  ;;  %v668_v37 = vpack.c.bf16 %v518_v59, %v517_v58 }
 0x35d   :  { %v669_v17 = vpack.c.bf16 %v520_v62, %v519_v3  ;;  %1022 = vxpose.xlu1.c.b16.start [1/4] (short) %v949_v57, 128 }
 0x35f   :  { %2082 = vmatpush3.bf16.msra.mxu1 %v663_v39 }
 0x360   :  { %2083 = vmatprep.subr.bf16.mxu1 %v664_v41 }
 0x363   :  { %2084 = vmatpush3.bf16.msra.mxu1 %v664_v41 }
 0x364   :  { %2085 = vmatprep.subr.bf16.mxu1 %v665_v5 }
 0x367   :  { %2086 = vmatpush3.bf16.msra.mxu1 %v665_v5 }
 0x368   :  { %2087 = vmatprep.subr.bf16.mxu1 %v666_v20 }
 0x36b   :  { %2088 = vmatpush3.bf16.msra.mxu1 %v666_v20 }
 0x36c   :  { %2089 = vmatprep.subr.bf16.mxu1 %v667_v60 }
 0x36f   :  { %2090 = vmatpush3.bf16.msra.mxu1 %v667_v60 }
 0x370   :  { %2091 = vmatprep.subr.bf16.mxu1 %v668_v37 }
 0x373   :  { %2092 = vmatpush3.bf16.msra.mxu1 %v668_v37 }
 0x374   :  { %2093 = vmatprep.subr.bf16.mxu1 %v669_v17 }
 0x377   :  { %2094 = vmatpush3.bf16.msra.mxu1 %v669_v17 }
 0x37a   :  { %2096 = vmatmul.mubr.bf16.vlgmr.msra.gmra.mrb[16].mxu1 %v659_v46  ;;  %v950_v46 = vpack.c.bf16 %v2843_v18, %v2838_v45 }
 0x37b   :  { %2099 = vmatprep.mubr.bf16.mxu1 %v660_v26  ;;  %v2850_v26 = vld [vmem:[%s3481_s0 + $0x60] sm:$0xff] }
 0x37c   :  { %1023 = vxpose.xlu1.c.b16.cont [2/4] (short) %v950_v46, 128  ;;  %v951_v50 = vpack.c.bf16 %v2855_v48, %v2850_v26 }
 0x380   :  { %1024 = vxpose.xlu1.c.b16.cont [3/4] (short) %v951_v50, 128 }
 0x382   :  { %2100 = vmatmul.mubr.bf16.gmra.mrb[20].mxu1 %v661_v29 }
 0x384   :  { %1025 = vxpose.xlu1.c.b16.end [4/4] (short) %v952_v40, 128 }
 0x44d   :  { %v2097_v44 = vpop.f32.mrb[16].mxu1 }
 0x44e   :  { %v704_v29 = vpop.f32.mrb[17].mxu1  ;;  %v737_v42 = vsub.f32 %v2483_v2, %v2097_v44 }
 0x44f   :  { %v2098_v36 = vpop.f32.mrb[18].mxu1  ;;  %v735_v63 = vsub.f32 %v2473_v0, %v704_v29 }
 0x450   :  { %v738_v19 = vsub.f32 %v2490_v4, %v2098_v36  ;;  %v707_v56 = vpop.f32.mrb[19].mxu1 }
 0x451   :  { %v736_v47 = vsub.f32 %v2478_v1, %v707_v56 }
 0x452   :  { %v744_v39 = vpack.c.bf16 %v738_v19, %v737_v42 }
 0x453   :  { %v743_v38 = vpack.c.bf16 %v736_v47, %v735_v63 }
 0x455   :  { %v2101_v35 = vpop.f32.mrb[20].mxu1  ;;  %2103 = vmatprep.subr.bf16.mxu0 %v743_v38 }
 0x456   :  { %v720_v41 = vpop.f32.mrb[21].mxu1  ;;  %2104 = vmatpush3.bf16.msra.mxu0 %v743_v38  ;;  %v741_v51 = vsub.f32 %v2514_v10, %v2101_v35  ;;  %v2887_v10 = vld [vmem:[%s3485_s4 + $0x10] sm:$0xff]  }
 0x457   :  { %v2102_v12 = vpop.f32.mrb[22].mxu1  ;;  %2105 = vmatprep.subr.bf16.mxu0 %v744_v39  ;;  %v739_v4 = vsub.f32 %v2497_v6, %v720_v41  ;;  %v2896_v6 = vld [vmem:[%s3485_s4 + $0x18] sm:$0xff]  }
 0x458   :  { %v742_v5 = vsub.f32 %v2521_v11, %v2102_v12  ;;  %v723_v2 = vpop.f32.mrb[23].mxu1 }
 0x459   :  { %v740_v9 = vsub.f32 %v2502_v7, %v723_v2  ;;  %v1030_v7 = vpop.trf.xlu1 }
 0x45a   :  { %v746_v0 = vpack.c.bf16 %v742_v5, %v741_v51  ;;  %2106 = vmatpush3.bf16.msra.mxu0 %v744_v39  ;;  %2143 = vmatprep.mubr.msk.bf16.mxu1 %vm119_vm0, %v1030_v7 }
 0x45b   :  { %v745_v1 = vpack.c.bf16 %v740_v9, %v739_v4 }
 0x45d   :  { %2107 = vmatprep.subr.bf16.mxu0 %v745_v1  ;;  %v1031_v59 = vpop.trf.xlu1 }
 0x45e   :  { %2108 = vmatpush3.bf16.msra.mxu0 %v745_v1 }
 0x45f   :  { %2109 = vmatprep.subr.bf16.mxu0 %v746_v0 }
 0x462   :  { %2110 = vmatpush3.bf16.msra.mxu0 %v746_v0 }
 0x463   :  { %2119 = vmatprep.subr.bf16.mxu0 %v949_v57 }
 0x465   :  { %2112 = vmatmul.mubr.msk.bf16.vlgmr.msra.gmra.mrb[16].mxu0 %vm119_vm0, %v2882_v21 }
 0x466   :  { %2120 = vmatpush3.bf16.msra.mxu0 %v949_v57  ;;  %2115 = vmatprep.mubr.msk.bf16.mxu0 %vm119_vm0, %v2887_v10 }
 0x467   :  { %2121 = vmatprep.subr.bf16.mxu0 %v950_v46 }
 0x46a   :  { %2122 = vmatpush3.bf16.msra.mxu0 %v950_v46 }
 0x46b   :  { %2123 = vmatprep.subr.bf16.mxu0 %v951_v50 }
 0x46d   :  { %2116 = vmatmul.mubr.msk.bf16.gmra.mrb[20].mxu0 %vm119_vm0, %v2896_v6 }
 0x46e   :  { %2124 = vmatpush3.bf16.msra.mxu0 %v951_v50  ;;  %2127 = vmatprep.mubr.msk.bf16.mxu0 %vm119_vm0, %v2507_v8 }
 0x46f   :  { %2125 = vmatprep.subr.bf16.mxu0 %v952_v40 }
 0x472   :  { %2126 = vmatpush3.bf16.msra.mxu0 %v952_v40 }
 0x473   :  { %2159 = vmatprep.subr.bf16.mxu0 %v949_v57 }
 0x475   :  { %2128 = vmatmul.mubr.msk.bf16.vlgmr.msra.gmra.mrb[24].mxu0 %vm119_vm0, %v2528_v13 }
 0x476   :  { %2160 = vmatpush3.bf16.msra.mxu0 %v949_v57  ;;  %2131 = vmatprep.mubr.msk.bf16.mxu0 %vm119_vm0, %v2533_v14 }
 0x477   :  { %2161 = vmatprep.subr.bf16.mxu0 %v950_v46 }
 0x47a   :  { %2162 = vmatpush3.bf16.msra.mxu0 %v950_v46  ;;  %v1032_v46 = vpop.trf.xlu1 }
 0x47b   :  { %2163 = vmatprep.subr.bf16.mxu0 %v951_v50 }
 0x47d   :  { %2132 = vmatmul.mubr.msk.bf16.gmra.mrb[28].mxu0 %vm119_vm0, %v2542_v15 }
 0x47e   :  { %2164 = vmatpush3.bf16.msra.mxu0 %v951_v50  ;;  %2167 = vmatprep.mubr.msk.bf16.mxu0 %vm119_vm0, %v2587_v52  ;;  %v1033_v19 = vpop.trf.xlu1 }
 0x47f   :  { %2165 = vmatprep.subr.bf16.mxu0 %v952_v40 }
 0x482   :  { %2166 = vmatpush3.bf16.msra.mxu0 %v952_v40  ;;  %v1034_v35 = vpop.trf.xlu1 }
 0x485   :  { %2168 = vmatmul.mubr.msk.bf16.vlgmr.msra.gmra.mrb[32].mxu0 %vm119_vm0, %v2592_v53 }
 0x486   :  { %2171 = vmatprep.mubr.msk.bf16.mxu0 %vm119_vm0, %v2601_v54 }
 0x48d   :  { %2172 = vmatmul.mubr.msk.bf16.gmra.mrb[36].mxu0 %vm119_vm0, %v2606_v55 }
 0x48e   :  { %2207 = vmatprep.mubr.msk.bf16.mxu0 %vm119_vm0, %v2819_v22 }
 0x538   :  { %v2919_v8 = vpop.f32.mrb[16].mxu0 }
 0x539   :  { %v2921_v11 = vpop.f32.mrb[17].mxu0 }
 0x53a   :  { %v2923_v13 = vpop.f32.mrb[18].mxu0 }
 0x53b   :  { %v2925_v14 = vpop.f32.mrb[19].mxu0 }
 0x540   :  { %v2927_v15 = vpop.f32.mrb[20].mxu0 }
 0x541   :  { %v2929_v52 = vpop.f32.mrb[21].mxu0 }
 0x542   :  { %v2931_v53 = vpop.f32.mrb[22].mxu0 }
 0x543   :  { %v2933_v54 = vpop.f32.mrb[23].mxu0 }
 0x548   :  { %v2129_v55 = vpop.f32.mrb[24].mxu0 }
 0x549   :  { %v987_v20 = vpop.f32.mrb[25].mxu0 }
 0x54a   :  { %v2130_v25 = vpop.f32.mrb[26].mxu0 }
 0x54b   :  { %v1019_v27 = vpack.c.bf16 %v2130_v25, %v2129_v55  ;;  %v990_v60 = vpop.f32.mrb[27].mxu0 }
 0x54c   :  { %v1018_v58 = vpack.c.bf16 %v990_v60, %v987_v20 }
 0x54e   :  { %2135 = vmatprep.subr.bf16.mxu1 %v1018_v58 }
 0x54f   :  { %2136 = vmatpush3.bf16.msra.mxu1 %v1018_v58 }
 0x550   :  { %v2133_v37 = vpop.f32.mrb[28].mxu0  ;;  %2137 = vmatprep.subr.bf16.mxu1 %v1019_v27 }
 0x551   :  { %v1003_v3 = vpop.f32.mrb[29].mxu0 }
 0x552   :  { %v2134_v62 = vpop.f32.mrb[30].mxu0 }
 0x553   :  { %v1021_v17 = vpack.c.bf16 %v2134_v62, %v2133_v37  ;;  %v1006_v22 = vpop.f32.mrb[31].mxu0  ;;  %2138 = vmatpush3.bf16.msra.mxu1 %v1019_v27 }
 0x554   :  { %v1020_v57 = vpack.c.bf16 %v1006_v22, %v1003_v3 }
 0x556   :  { %2139 = vmatprep.subr.bf16.mxu1 %v1020_v57 }
 0x557   :  { %2140 = vmatpush3.bf16.msra.mxu1 %v1020_v57 }
 0x558   :  { %2141 = vmatprep.subr.bf16.mxu1 %v1021_v17  ;;  %v2169_v50 = vpop.f32.mrb[32].mxu0 }
 0x559   :  { %v1376_v40 = vpop.f32.mrb[33].mxu0  ;;  %v2936_v29 = vadd.f32 %v2169_v50, %v2764_v32 }
 0x55a   :  { %v2170_v44 = vpop.f32.mrb[34].mxu0  ;;  %v1377_v56 = vadd.f32 %v1376_v40, %v2756_v30 }
 0x55b   :  { %v2939_v36 = vadd.f32 %v2170_v44, %v2778_v61  ;;  %2142 = vmatpush3.bf16.msra.mxu1 %v1021_v17  ;;  %v1379_v42 = vpop.f32.mrb[35].mxu0 }
 0x55c   :  { %v1380_v63 = vadd.f32 %v1379_v42, %v2767_v43 }
 0x55d   :  { %v1408_v47 = vpack.c.bf16 %v2939_v36, %v2936_v29 }
 0x55e   :  { %v1407_v39 = vpack.c.bf16 %v1380_v63, %v1377_v56  ;;  %2144 = vmatmul.mubr.msk.bf16.vlgmr.msra.gmra.mrb[24].mxu1 %vm119_vm0, %v1031_v59 }
 0x55f   :  { %2147 = vmatprep.mubr.msk.bf16.mxu1 %vm119_vm0, %v1032_v46 }
 0x560   :  { %v2173_v32 = vpop.f32.mrb[36].mxu0 }
 0x561   :  { %v1392_v38 = vpop.f32.mrb[37].mxu0  ;;  %v2948_v41 = vadd.f32 %v2173_v32, %v2795_v28  ;;  %v1035_v28 = vpop.trf.xlu1 }
 0x562   :  { %v2174_v61 = vpop.f32.mrb[38].mxu0  ;;  %v2954_v43 = vadd.f32 %v1392_v38, %v2787_v33 }
 0x563   :  { %v2951_v12 = vadd.f32 %v2174_v61, %v2799_v49  ;;  %v1395_v30 = vpop.f32.mrb[39].mxu0 }
 0x564   :  { %v2957_v51 = vadd.f32 %v1395_v30, %v2791_v23 }
 0x565   :  { %v1410_v5 = vpack.c.bf16 %v2951_v12, %v2948_v41  ;;  %v1036_v49 = vpop.trf.xlu1 }
 0x566   :  { %v1409_v2 = vpack.c.bf16 %v2957_v51, %v2954_v43  ;;  %2148 = vmatmul.mubr.msk.bf16.gmra.mrb[28].mxu1 %vm119_vm0, %v1033_v19 }
 0x567   :  { %2151 = vmatprep.mubr.msk.bf16.mxu1 %vm119_vm0, %v1034_v35 }
 0x569   :  { %v1037_v33 = vpop.trf.xlu1 }
 0x56e   :  { %2152 = vmatmul.mubr.msk.bf16.gmra.mrb[32].mxu1 %vm119_vm0, %v1035_v28 }
 0x56f   :  { %2155 = vmatprep.mubr.msk.bf16.mxu1 %vm119_vm0, %v1036_v49 }
 0x576   :  { %2156 = vmatmul.mubr.msk.bf16.gmra.mrb[36].mxu1 %vm119_vm0, %v1037_v33 }
 0x577   :  { %2191 = vmatprep.mubr.bf16.mxu1 %v1407_v39 }
 0x631   :  { %v2145_v23 = vpop.f32.mrb[24].mxu1 }
 0x632   :  { %1163 = vmax.xlane.f32.xlu0 %v2145_v23  ;;  %v1096_v4 = vpop.f32.mrb[25].mxu1 }
 0x633   :  { %v2146_v9 = vpop.f32.mrb[26].mxu1 }
 0x634   :  { %v1099_v0 = vpop.f32.mrb[27].mxu1 }
 0x636   :  { %1159 = vmax.xlane.f32.xlu0 %v1096_v4 }
 0x639   :  { %v2149_v1 = vpop.f32.mrb[28].mxu1 }
 0x63a   :  { %1165 = vmax.xlane.f32.xlu0 %v2146_v9  ;;  %v1112_v7 = vpop.f32.mrb[29].mxu1 }
 0x63b   :  { %v2150_v55 = vpop.f32.mrb[30].mxu1 }
 0x63c   :  { %v1115_v20 = vpop.f32.mrb[31].mxu1 }
 0x63d   :  { %1169 = vmax.xlane.f32.xlu1 %v1115_v20 }
 0x63e   :  { %1161 = vmax.xlane.f32.xlu0 %v1099_v0 }
 0x641   :  { %v2968_v25 = vpop.f32.mrb[32].mxu1 }
 0x642   :  { %1167 = vmax.xlane.f32.xlu0 %v1112_v7  ;;  %v2970_v27 = vpop.f32.mrb[33].mxu1 }
 0x643   :  { %v2972_v60 = vpop.f32.mrb[34].mxu1 }
 0x644   :  { %v2974_v58 = vpop.f32.mrb[35].mxu1 }
 0x646   :  { %1171 = vmax.xlane.f32.xlu0 %v2149_v1 }
 0x649   :  { %v2976_v59 = vpop.f32.mrb[36].mxu1 }
 0x64a   :  { %1173 = vmax.xlane.f32.xlu0 %v2150_v55  ;;  %v2978_v37 = vpop.f32.mrb[37].mxu1 }
 0x64b   :  { %v2980_v3 = vpop.f32.mrb[38].mxu1 }
 0x64c   :  { %v2982_v62 = vpop.f32.mrb[39].mxu1 }
 0x64d   :  { %1185 = vmax.xlane.f32.xlu1 %v2982_v62 }
 0x64e   :  { %1179 = vmax.xlane.f32.xlu0 %v2968_v25 }
 0x651   :  { %1189 = vmax.xlane.f32.xlu1 %v2980_v3 }
 0x652   :  { %1175 = vmax.xlane.f32.xlu0 %v2970_v27 }
 0x656   :  { %1177 = vmax.xlane.f32.xlu0 %v2974_v58 }
 0x65a   :  { %1181 = vmax.xlane.f32.xlu0 %v2972_v60 }
 0x65e   :  { %1183 = vmax.xlane.f32.xlu0 %v2978_v37 }
 0x662   :  { %1187 = vmax.xlane.f32.xlu0 %v2976_v59 }
 0x6bf   :  { %v1164_v17 = vpop.xlane.xlu0 %1163 }
 0x6c0   :  { %v1193_v57 = vsub.f32 %v2145_v23, %v1164_v17 }
 0x6c2   :  { %v1211_v44 = vmul.f32 1.442695, %v1193_v57 }
 0x6c3   :  { %v1160_v22 = vpop.xlane.xlu0 %1159 }
 0x6c4   :  { %v1191_v46 = vsub.f32 %v1096_v4, %v1160_v22 }
 0x6c6   :  { %v1207_v50 = vmul.f32 1.442695, %v1191_v46 }
 0x6c7   :  { %v1166_v40 = vpop.xlane.xlu0 %1165 }
 0x6c8   :  { %2299 = vpow2.f32 %v1207_v50  ;;  %v1194_v42 = vsub.f32 %v2146_v9, %v1166_v40 }
 0x6c9   :  { %2301 = vpow2.f32 %v1211_v44 }
 0x6ca   :  { %v1170_v56 = vpop.xlane.xlu1 %1169  ;;  %v1213_v32 = vmul.f32 1.442695, %v1194_v42 }
 0x6cb   :  { %v1162_v19 = vpop.xlane.xlu0 %1161  ;;  %v1196_v38 = vsub.f32 %v1115_v20, %v1170_v56 }
 0x6cc   :  { %v1192_v63 = vsub.f32 %v1099_v0, %v1162_v19 }
 0x6cd   :  { %v1217_v49 = vmul.f32 1.442695, %v1196_v38 }
 0x6ce   :  { %v1209_v39 = vmul.f32 1.442695, %v1192_v63 }
 0x6cf   :  { %v1168_v35 = vpop.xlane.xlu0 %1167 }
 0x6d0   :  { %2303 = vpow2.f32 %v1209_v39  ;;  %v1195_v61 = vsub.f32 %v1112_v7, %v1168_v35 }
 0x6d1   :  { %2305 = vpow2.f32 %v1213_v32 }
 0x6d2   :  { %v2992_v30 = vpop.eup %2299  ;;  %v1215_v28 = vmul.f32 1.442695, %v1195_v61 }
 0x6d3   :  { %v1172_v33 = vpop.xlane.xlu0 %1171  ;;  %1239 = vadd.xlane.f32.xlu0 %v2992_v30  ;;  %v2995_v4 = vpop.eup %2301 }
 0x6d4   :  { %2307 = vpow2.f32 %v1215_v28  ;;  %v1197_v23 = vsub.f32 %v2149_v1, %v1172_v33 }
 0x6d5   :  { %2309 = vpow2.f32 %v1217_v49 }
 0x6d6   :  { %v1219_v9 = vmul.f32 1.442695, %v1197_v23 }
 0x6d7   :  { %v1174_v0 = vpop.xlane.xlu0 %1173  ;;  %1243 = vadd.xlane.f32.xlu0 %v2995_v4 }
 0x6d8   :  { %2311 = vpow2.f32 %v1219_v9  ;;  %v1198_v20 = vsub.f32 %v2150_v55, %v1174_v0 }
 0x6da   :  { %v2998_v7 = vpop.eup %2303  ;;  %v1221_v17 = vmul.f32 1.442695, %v1198_v20  ;;  %v1186_v42 = vpop.xlane.xlu1 %1185 }
 0x6db   :  { %v1180_v22 = vpop.xlane.xlu0 %1179  ;;  %1241 = vadd.xlane.f32.xlu1 %v2998_v7  ;;  %v3001_v57 = vpop.eup %2305 }
 0x6dc   :  { %2313 = vpow2.f32 %v1221_v17  ;;  %v1201_v1 = vsub.f32 %v2968_v25, %v1180_v22 }
 0x6de   :  { %v3003_v46 = vpop.eup %2307  ;;  %v1227_v56 = vmul.f32 1.442695, %v1201_v1  ;;  %v1190_v35 = vpop.xlane.xlu1 %1189 }
 0x6df   :  { %v1176_v50 = vpop.xlane.xlu0 %1175  ;;  %1247 = vadd.xlane.f32.xlu0 %v3003_v46  ;;  %1245 = vadd.xlane.f32.xlu1 %v3001_v57  ;;  %v3009_v40 = vpop.eup %2309  ;;  %v1206_v33 = vsub.f32 %v2980_v3, %v1190_v35 }
 0x6e0   :  { %v1199_v55 = vsub.f32 %v2970_v27, %v1176_v50  ;;  %v1204_v27 = vsub.f32 %v2982_v62, %v1186_v42  ;;  %v64_v42 = vld [vmem:[%s3486_s5 + $0x8] sm:$0xff] }
 0x6e1   :  { %v1237_v62 = vmul.f32 1.442695, %v1206_v33 }
 0x6e2   :  { %v3011_v44 = vpop.eup %2311  ;;  %v1223_v19 = vmul.f32 1.442695, %v1199_v55  ;;  %v1233_v49 = vmul.f32 1.442695, %v1204_v27  ;;  %v68_v27 = vld [vmem:[%s3486_s5 + $0x28] sm:$0xff] }
 0x6e3   :  { %v1178_v63 = vpop.xlane.xlu0 %1177  ;;  %1251 = vadd.xlane.f32.xlu0 %v3011_v44  ;;  %1249 = vadd.xlane.f32.xlu1 %v3009_v40 }
 0x6e4   :  { %2315 = vpow2.f32 %v1223_v19  ;;  %v1200_v25 = vsub.f32 %v2974_v58, %v1178_v63  ;;  %v65_v19 = vld [vmem:[%s3486_s5 + $0x10] sm:$0xff]  ;;  %v67_v63 = vld [vmem:[%s3486_s5 + $0x20] sm:$0xff] }
 0x6e5   :  { %2317 = vpow2.f32 %v1227_v56  ;;  %v63_v56 = vld [vmem:[%s3486_s5] sm:$0xff] }
 0x6e6   :  { %v3016_v39 = vpop.eup %2313  ;;  %v1225_v32 = vmul.f32 1.442695, %v1200_v25  ;;  %v66_v25 = vld [vmem:[%s3486_s5 + $0x18] sm:$0xff] }
 0x6e7   :  { %v1182_v38 = vpop.xlane.xlu0 %1181  ;;  %1253 = vadd.xlane.f32.xlu1 %v3016_v39 }
 0x6e8   :  { %2319 = vpow2.f32 %v1225_v32  ;;  %v1202_v61 = vsub.f32 %v2972_v60, %v1182_v38  ;;  %v69_v32 = vld [vmem:[%s3486_s5 + $0x30] sm:$0xff]  ;;  %v70_v38 = vld [vmem:[%s3486_s5 + $0x38] sm:$0xff]  ;;  %s2422_s5 = smov [#allocation2]  }
 0x6e9   :  { %s1856_s18 = sshll.u32 %s2422_s5, 4  ;;  %s1857_s18 = int_to_ptr.vmem [resolvable:$true] %s1856_s18 }
 0x6ea   :  { %v1229_v28 = vmul.f32 1.442695, %v1202_v61  ;;  %s2397_s25 = scalar_lea.vmem %s1857_s18, 2048  ;;  %p2402_p1 = scmp.lt.s32.totalorder %s1857_s18, %s1857_s18 }
 0x6eb   :  { %v1184_v23 = vpop.xlane.xlu0 %1183  ;;  %p2398_p0 = scmp.ne.s32.totalorder %s1857_s18, %s2397_s25  ;;  %p2403_p2 = scmp.lt.s32.totalorder %s2397_s25, %s2397_s25 }
 0x6ec   :  { %2321 = vpow2.f32 %v1229_v28  ;;  %v1203_v58 = vsub.f32 %v2978_v37, %v1184_v23 }
 0x6ed   :  { %2323 = vpow2.f32 %v1233_v49  ;;  %p2404_p3 = por %p2403_p2, %p2402_p1 }
 0x6ee   :  { %v3023_v9 = vpop.eup %2315  ;;  %v1231_v0 = vmul.f32 1.442695, %v1203_v58 }
 0x6ef   :  { %1255 = vadd.xlane.f32.xlu0 %v3023_v9  ;;  %v1188_v20 = vpop.xlane.xlu0 %1187  ;;  %v3027_v60 = vpop.eup %2317  ;;  %p2405_p4 = pnand %p2404_p3, %p2398_p0 }
 0x6f0   :  { %2325 = vpow2.f32 %v1231_v0  ;;  %v1205_v17 = vsub.f32 %v2976_v59, %v1188_v20 }
 0x6f1   :  { %2327 = vpow2.f32 %v1237_v62 }
 0x6f2   :  { %v3029_v22 = vpop.eup %2319  ;;  %v1235_v3 = vmul.f32 1.442695, %v1205_v17 }
 0x6f3   :  { %1259 = vadd.xlane.f32.xlu0 %v3027_v60  ;;  %1257 = vadd.xlane.f32.xlu1 %v3029_v22 }
 0x6f4   :  { %2329 = vpow2.f32 %v1235_v3 }
 0x6f6   :  { %v3033_v37 = vpop.eup %2321 }
 0x6f7   :  { %1261 = vadd.xlane.f32.xlu1 %v3033_v37  ;;  %v3036_v1 = vpop.eup %2323 }
 0x6fa   :  { %v3038_v50 = vpop.eup %2325 }
 0x6fb   :  { %1263 = vadd.xlane.f32.xlu0 %v3038_v50  ;;  %1265 = vadd.xlane.f32.xlu1 %v3036_v1  ;;  %v3042_v59 = vpop.eup %2327 }
 0x6fe   :  { %v3044_v55 = vpop.eup %2329 }
 0x6ff   :  { %1267 = vadd.xlane.f32.xlu0 %v3044_v55  ;;  %1269 = vadd.xlane.f32.xlu1 %v3042_v59 }
 0x710   :  { %754 = vperm.xlu1 %2219, %v64_v42  }
 0x714   :  { %759 = vperm.xlu1 %2219, %v65_v19  }
 0x715   :  { %749 = vperm.xlu0 %2220, %v63_v56  }
 0x718   :  { %769 = vperm.xlu1 %2219, %v67_v63  }
 0x719   :  { %764 = vperm.xlu0 %2220, %v66_v25  }
 0x71c   :  { %779 = vperm.xlu1 %2219, %v69_v32  }
 0x71d   :  { %774 = vperm.xlu0 %2220, %v68_v27  }
 0x721   :  { %784 = vperm.xlu0 %2220, %v70_v38  }
 0x760   :  { %v1240_v35 = vpop.xlane.xlu0 %1239 }
 0x761   :  { %2331 = vrcp.f32 %v1240_v35 }
 0x764   :  { %v1244_v61 = vpop.xlane.xlu0 %1243 }
 0x765   :  { %2333 = vrcp.f32 %v1244_v61 }
 0x768   :  { %v1242_v28 = vpop.xlane.xlu1 %1241 }
 0x769   :  { %2335 = vrcp.f32 %v1242_v28 }
 0x76b   :  { %v2332_v58 = vpop.eup %2331 }
 0x76c   :  { %v1246_v49 = vpop.xlane.xlu1 %1245  ;;  %v1248_v33 = vpop.xlane.xlu0 %1247  ;;  %v3073_v20 = vmul.f32 %v2332_v58, %v2992_v30 }
 0x76d   :  { %2337 = vrcp.f32 %v1246_v49 }
 0x76e   :  { %2339 = vrcp.f32 %v1248_v33 }
 0x76f   :  { %v2334_v0 = vpop.eup %2333 }
 0x770   :  { %v1250_v23 = vpop.xlane.xlu1 %1249  ;;  %v1252_v3 = vpop.xlane.xlu0 %1251  ;;  %v3079_v42 = vmul.f32 %v2334_v0, %v2995_v4 }
 0x771   :  { %2341 = vrcp.f32 %v1250_v23 }
 0x772   :  { %2343 = vrcp.f32 %v1252_v3 }
 0x773   :  { %v2336_v62 = vpop.eup %2335 }
 0x774   :  { %v3076_v17 = vmul.f32 %v2336_v62, %v2998_v7  ;;  %v1254_v56 = vpop.xlane.xlu1 %1253 }
 0x775   :  { %2345 = vrcp.f32 %v1254_v56 }
 0x776   :  { %v1303_v19 = vadd.f32 %v3076_v17, %v3073_v20 }
 0x777   :  { %v2338_v63 = vpop.eup %2337 }
 0x778   :  { %v1304_v25 = vadd.f32 %v1303_v19, %v3079_v42  ;;  %v3085_v32 = vmul.f32 %v2338_v63, %v3001_v57  ;;  %v2340_v30 = vpop.eup %2339 }
 0x779   :  { %v3089_v4 = vmul.f32 %v2340_v30, %v3003_v46 }
 0x77a   :  { %v1305_v7 = vadd.f32 %v1304_v25, %v3085_v32 }
 0x77b   :  { %v2342_v27 = vpop.eup %2341 }
 0x77c   :  { %v1256_v38 = vpop.xlane.xlu0 %1255  ;;  %v3092_v35 = vmul.f32 %v2342_v27, %v3009_v40  ;;  %v1306_v61 = vadd.f32 %v1305_v7, %v3089_v4  ;;  %v2344_v57 = vpop.eup %2343 }
 0x77d   :  { %2347 = vrcp.f32 %v1256_v38  ;;  %v3097_v0 = vmul.f32 %v2344_v57, %v3011_v44 }
 0x77e   :  { %v1307_v33 = vadd.f32 %v1306_v61, %v3092_v35 }
 0x77f   :  { %v2346_v23 = vpop.eup %2345 }
 0x780   :  { %v1260_v28 = vpop.xlane.xlu0 %1259  ;;  %v1258_v49 = vpop.xlane.xlu1 %1257  ;;  %v3100_v62 = vmul.f32 %v2346_v23, %v3016_v39  ;;  %v1308_v40 = vadd.f32 %v1307_v33, %v3097_v0 }
 0x781   :  { %2349 = vrcp.f32 %v1260_v28 }
 0x782   :  { %2351 = vrcp.f32 %v1258_v49  ;;  %v1309_v25 = vadd.f32 %v1308_v40, %v3100_v62 }
 0x784   :  { %v1262_v58 = vpop.xlane.xlu1 %1261 }
 0x785   :  { %2353 = vrcp.f32 %v1262_v58 }
 0x787   :  { %v2348_v46 = vpop.eup %2347 }
 0x788   :  { %v1264_v3 = vpop.xlane.xlu0 %1263  ;;  %v1266_v19 = vpop.xlane.xlu1 %1265  ;;  %v3104_v56 = vmul.f32 %v2348_v46, %v3023_v9 }
 0x789   :  { %2355 = vrcp.f32 %v1264_v3 }
 0x78a   :  { %2357 = vrcp.f32 %v1266_v19  ;;  %v1310_v39 = vadd.f32 %v1309_v25, %v3104_v56 }
 0x78b   :  { %v2350_v63 = vpop.eup %2349 }
 0x78c   :  { %v2352_v30 = vpop.eup %2351  ;;  %v1268_v44 = vpop.xlane.xlu0 %1267  ;;  %v3112_v61 = vmul.f32 %v2350_v63, %v3027_v60 }
 0x78d   :  { %v1270_v7 = vpop.xlane.xlu1 %1269  ;;  %v3108_v27 = vmul.f32 %v2352_v30, %v3029_v22  ;;  %2359 = vrcp.f32 %v1268_v44 }
 0x78e   :  { %2361 = vrcp.f32 %v1270_v7 }
 0x78f   :  { %v2354_v38 = vpop.eup %2353  ;;  %v1311_v9 = vadd.f32 %v1310_v39, %v3108_v27 }
 0x790   :  { %v3116_v28 = vmul.f32 %v2354_v38, %v3033_v37 }
 0x791   :  { %v3118_v49 = vpop.permute.xlu1 %754  ;;  %v1312_v22 = vadd.f32 %v1311_v9, %v3112_v61 }
 0x792   :  { %v3122_v57 = vadd.f32 %v2925_v14, %v3118_v49 }
 0x793   :  { %v2356_v33 = vpop.eup %2355  ;;  %v1313_v37 = vadd.f32 %v1312_v22, %v3116_v28 }
 0x794   :  { %886 = vadd.xlane.f32.xlu0 %v3122_v57  ;;  %v2358_v23 = vpop.eup %2357  ;;  %v3127_v60 = vmul.f32 %v2356_v33, %v3038_v50  ;;  %v3129_v58 = vpop.permute.xlu0 %749 }
 0x795   :  { %v3131_v46 = vpop.permute.xlu1 %759  ;;  %v3136_v40 = vadd.f32 %v2921_v11, %v3129_v58  ;;  %v3143_v3 = vmul.f32 %v2358_v23, %v3036_v1 }
 0x796   :  { %v3140_v14 = vadd.f32 %v2919_v8, %v3131_v46  ;;  %v1314_v50 = vadd.f32 %v1313_v37, %v3127_v60 }
 0x797   :  { %v2360_v19 = vpop.eup %2359  ;;  %884 = vadd.xlane.f32.xlu1 %v3136_v40 }
 0x798   :  { %888 = vadd.xlane.f32.xlu0 %v3140_v14  ;;  %v2362_v63 = vpop.eup %2361  ;;  %v3149_v25 = vmul.f32 %v2360_v19, %v3044_v55  ;;  %v3151_v11 = vpop.permute.xlu0 %764  ;;  %v1315_v8 = vadd.f32 %v1314_v50, %v3143_v3  ;;  %v909_v50 = vmul.f32 %v3122_v57, %v3122_v57  ;;  %v910_v19 = vmul.f32 %v3140_v14, %v3140_v14 }
 0x799   :  { %v3153_v30 = vpop.permute.xlu1 %769  ;;  %v3158_v1 = vadd.f32 %v2923_v13, %v3151_v11  ;;  %v3165_v7 = vmul.f32 %v2362_v63, %v3042_v59 }
 0x79a   :  { %v3162_v44 = vadd.f32 %v2929_v52, %v3153_v30  ;;  %v1316_v55 = vadd.f32 %v1315_v8, %v3149_v25 }
 0x79b   :  { %890 = vadd.xlane.f32.xlu1 %v3158_v1 }
 0x79c   :  { %892 = vadd.xlane.f32.xlu0 %v3162_v44  ;;  %v3170_v39 = vpop.permute.xlu0 %774  ;;  %v1317_v13 = vadd.f32 %v1316_v55, %v3165_v7  ;;  %v912_v55 = vmul.f32 %v3162_v44, %v3162_v44 }
 0x79d   :  { %v3172_v38 = vpop.permute.xlu1 %779  ;;  %v3177_v9 = vadd.f32 %v2933_v54, %v3170_v39  ;;  %v908_v54 = vmul.f32 %v3136_v40, %v3136_v40 }
 0x79e   :  { %v3181_v52 = vadd.f32 %v2927_v15, %v3172_v38  ;;  %v1318_v59 = vrot.slane %v1317_v13, 4 }
 0x79f   :  { %894 = vadd.xlane.f32.xlu1 %v3177_v9 }
 0x7a0   :  { %896 = vadd.xlane.f32.xlu0 %v3181_v52  ;;  %v3185_v22 = vpop.permute.xlu0 %784  ;;  %v1319_v33 = vadd.f32 %v1318_v59, %v1317_v13  ;;  %v913_v59 = vmul.f32 %v3177_v9, %v3177_v9 }
 0x7a1   :  { %v3189_v23 = vadd.f32 %v2931_v53, %v3185_v22  ;;  %v911_v53 = vmul.f32 %v3158_v1, %v3158_v1 }
 0x7a2   :  { %v1320_v37 = vrot.slane %v1319_v33, 2 }
 0x7a3   :  { %898 = vadd.xlane.f32.xlu1 %v3189_v23 }
 0x7a4   :  { %916 = vadd.xlane.f32.xlu0 %v908_v54  ;;  %v1321_v15 = vadd.f32 %v1320_v37, %v1319_v33  ;;  %v914_v33 = vmul.f32 %v3181_v52, %v3181_v52  ;;  %v915_v54 = vmul.f32 %v3189_v23, %v3189_v23 }
 0x7a6   :  { %v1322_v63 = vrot.slane %v1321_v15, 1 }
 0x7a7   :  { %918 = vadd.xlane.f32.xlu1 %v909_v50 }
 0x7a8   :  { %920 = vadd.xlane.f32.xlu0 %v910_v19  ;;  %v1323_v8 = vadd.f32 %v1322_v63, %v1321_v15 }
 0x7aa   :  { %v1324_v13 = vadd.f32 1e-09, %v1323_v8 }
 0x7ab   :  { %922 = vadd.xlane.f32.xlu1 %v911_v53 }
 0x7ac   :  { %924 = vadd.xlane.f32.xlu0 %v912_v55  ;;  %2363 = vrcp.f32 %v1324_v13 }
 0x7af   :  { %926 = vadd.xlane.f32.xlu1 %v913_v59 }
 0x7b0   :  { %928 = vadd.xlane.f32.xlu0 %v914_v33 }
 0x7b3   :  { %930 = vadd.xlane.f32.xlu1 %v915_v54 }
 0x7b6   :  { %v2364_v37 = vpop.eup %2363 }
 0x7b7   :  { %v1326_v15 = vmul.f32 %v2364_v37, %v3073_v20  ;;  %v1327_v50 = vmul.f32 %v2364_v37, %v3076_v17  ;;  %v1328_v19 = vmul.f32 %v2364_v37, %v3079_v42  ;;  %v1329_v63 = vmul.f32 %v2364_v37, %v3085_v32 }
 0x7b8   :  { %v1330_v55 = vmul.f32 %v2364_v37, %v3089_v4  ;;  %v1331_v13 = vmul.f32 %v2364_v37, %v3092_v35  ;;  %v1332_v33 = vmul.f32 %v2364_v37, %v3097_v0  ;;  %v1333_v20 = vmul.f32 %v2364_v37, %v3100_v62 }
 0x7b9   :  { %v1411_v8 = vpack.c.bf16 %v1327_v50, %v1326_v15  ;;  %v1412_v53 = vpack.c.bf16 %v1329_v63, %v1328_v19  ;;  %v1334_v42 = vmul.f32 %v2364_v37, %v3104_v56  ;;  %v1335_v32 = vmul.f32 %v2364_v37, %v3108_v27 }
 0x7ba   :  { %v1413_v59 = vpack.c.bf16 %v1331_v13, %v1330_v55  ;;  %v1414_v17 = vpack.c.bf16 %v1333_v20, %v1332_v33  ;;  %v1336_v4 = vmul.f32 %v2364_v37, %v3112_v61  ;;  %v1337_v35 = vmul.f32 %v2364_v37, %v3116_v28 }
 0x7bb   :  { %2175 = vmatprep.subr.bf16.mxu1 %v1411_v8  ;;  %v1415_v54 = vpack.c.bf16 %v1335_v32, %v1334_v42  ;;  %v1338_v0 = vmul.f32 %v2364_v37, %v3127_v60  ;;  %v1339_v62 = vmul.f32 %v2364_v37, %v3143_v3  ;;  %v1340_v56 = vmul.f32 %v2364_v37, %v3149_v25  ;;  %v79_v42 = vld [vmem:[%s3488_s7] sm:$0xff]  ;;  %v80_v32 = vld [vmem:[%s3488_s7 + $0x8] sm:$0xff] }
 0x7bc   :  { %2176 = vmatpush3.bf16.msra.mxu1 %v1411_v8  ;;  %v1416_v15 = vpack.c.bf16 %v1337_v35, %v1336_v4  ;;  %v1341_v27 = vmul.f32 %v2364_v37, %v3165_v7  ;;  %v82_v4 = vld [vmem:[%s3488_s7 + $0x18] sm:$0xff]  ;;  %v83_v35 = vld [vmem:[%s3488_s7 + $0x20] sm:$0xff] }
 0x7bd   :  { %2177 = vmatprep.subr.bf16.mxu1 %v1412_v53  ;;  %v1417_v50 = vpack.c.bf16 %v1339_v62, %v1338_v0 }
 0x7be   :  { %v1418_v19 = vpack.c.bf16 %v1341_v27, %v1340_v56 }
 0x7c0   :  { %2178 = vmatpush3.bf16.msra.mxu1 %v1412_v53 }
 0x7c1   :  { %2179 = vmatprep.subr.bf16.mxu1 %v1413_v59 }
 0x7c4   :  { %2180 = vmatpush3.bf16.msra.mxu1 %v1413_v59 }
 0x7c5   :  { %2181 = vmatprep.subr.bf16.mxu1 %v1414_v17 }
 0x7c8   :  { %2182 = vmatpush3.bf16.msra.mxu1 %v1414_v17 }
 0x7c9   :  { %2183 = vmatprep.subr.bf16.mxu1 %v1415_v54 }
 0x7cc   :  { %2184 = vmatpush3.bf16.msra.mxu1 %v1415_v54  ;;  %v81_v54 = vld [vmem:[%s3488_s7 + $0x10] sm:$0xff] }
 0x7cd   :  { %2185 = vmatprep.subr.bf16.mxu1 %v1416_v15 }
 0x7d0   :  { %2186 = vmatpush3.bf16.msra.mxu1 %v1416_v15  ;;  %v84_v15 = vld [vmem:[%s3488_s7 + $0x28] sm:$0xff] }
 0x7d1   :  { %2187 = vmatprep.subr.bf16.mxu1 %v1417_v50 }
 0x7d4   :  { %2188 = vmatpush3.bf16.msra.mxu1 %v1417_v50 }
 0x7d5   :  { %2189 = vmatprep.subr.bf16.mxu1 %v1418_v19 }
 0x7d8   :  { %2190 = vmatpush3.bf16.msra.mxu1 %v1418_v19 }
 0x7db   :  { %2192 = vmatmul.mubr.bf16.vlgmr.msra.gmra.mrb[40].mxu1 %v1408_v47 }
 0x7dc   :  { %2195 = vmatprep.mubr.bf16.mxu1 %v1409_v2 }
 0x7e3   :  { %2196 = vmatmul.mubr.bf16.gmra.mrb[44].mxu1 %v1410_v5 }
 0x821   :  { %v887_v0 = vpop.xlane.xlu0 %886 }
 0x824   :  { %v885_v62 = vpop.xlane.xlu1 %884 }
 0x825   :  { %v889_v50 = vpop.xlane.xlu0 %888 }
 0x828   :  { %v891_v56 = vpop.xlane.xlu1 %890 }
 0x829   :  { %v893_v27 = vpop.xlane.xlu0 %892 }
 0x82c   :  { %v895_v19 = vpop.xlane.xlu1 %894 }
 0x8ae   :  { %v2193_v61 = vpop.f32.mrb[40].mxu1 }
 0x8af   :  { %v1453_v28 = vpop.f32.mrb[41].mxu1  ;;  %v1486_v3 = vsub.f32 %v2838_v45, %v2193_v61  ;;  %v897_v61 = vpop.xlane.xlu0 %896 }
 0x8b0   :  { %v2194_v60 = vpop.f32.mrb[42].mxu1  ;;  %v1484_v37 = vsub.f32 %v2826_v24, %v1453_v28  ;;  %v899_v28 = vpop.xlane.xlu1 %898 }
 0x8b1   :  { %v1487_v25 = vsub.f32 %v2843_v18, %v2194_v60  ;;  %v1456_v7 = vpop.f32.mrb[43].mxu1 }
 0x8b2   :  { %v1485_v29 = vsub.f32 %v2831_v34, %v1456_v7 }
 0x8b3   :  { %v1493_v36 = vpack.c.bf16 %v1487_v25, %v1486_v3  ;;  %v917_v60 = vpop.xlane.xlu0 %916 }
 0x8b4   :  { %v1492_v47 = vpack.c.bf16 %v1485_v29, %v1484_v37  ;;  %v919_v3 = vpop.xlane.xlu1 %918 }
 0x8b6   :  { %v2197_v43 = vpop.f32.mrb[44].mxu1  ;;  %2199 = vmatprep.subr.bf16.mxu0 %v1492_v47 }
 0x8b7   :  { %v1469_v51 = vpop.f32.mrb[45].mxu1  ;;  %2200 = vmatpush3.bf16.msra.mxu0 %v1492_v47  ;;  %v1490_v12 = vsub.f32 %v2862_v31, %v2197_v43  ;;  %v921_v25 = vpop.xlane.xlu0 %920 }
 0x8b8   :  { %v2198_v41 = vpop.f32.mrb[46].mxu1  ;;  %2201 = vmatprep.subr.bf16.mxu0 %v1493_v36  ;;  %v1488_v18 = vsub.f32 %v2850_v26, %v1469_v51  ;;  %v923_v7 = vpop.xlane.xlu1 %922 }
 0x8b9   :  { %v1491_v5 = vsub.f32 %v2867_v16, %v2198_v41  ;;  %v1472_v45 = vpop.f32.mrb[47].mxu1 }
 0x8ba   :  { %v1489_v2 = vsub.f32 %v2855_v48, %v1472_v45 }
 0x8bb   :  { %v1495_v24 = vpack.c.bf16 %v1491_v5, %v1490_v12  ;;  %2202 = vmatpush3.bf16.msra.mxu0 %v1493_v36  ;;  %v925_v37 = vpop.xlane.xlu0 %924 }
 0x8bc   :  { %v1494_v34 = vpack.c.bf16 %v1489_v2, %v1488_v18  ;;  %v927_v29 = vpop.xlane.xlu1 %926 }
 0x8be   :  { %2203 = vmatprep.subr.bf16.mxu0 %v1494_v34 }
 0x8bf   :  { %2204 = vmatpush3.bf16.msra.mxu0 %v1494_v34  ;;  %v3313_v36 = vpop.xlane.xlu0 %928 }
 0x8c0   :  { %2205 = vmatprep.subr.bf16.mxu0 %v1495_v24  ;;  %v3315_v47 = vpop.xlane.xlu1 %930 }
 0x8c3   :  { %2206 = vmatpush3.bf16.msra.mxu0 %v1495_v24 }
 0x8c6   :  { %2208 = vmatmul.mubr.msk.bf16.vlgmr.msra.gmra.mrb[40].mxu0 %vm119_vm0, %v2882_v21 }
 0x8c7   :  { %2211 = vmatprep.mubr.msk.bf16.mxu0 %vm119_vm0, %v2887_v10 }
 0x8ce   :  { %2212 = vmatmul.mubr.msk.bf16.gmra.mrb[44].mxu0 %vm119_vm0, %v2896_v6 }
 0x999   :  { %v2209_v31 = vpop.f32.mrb[40].mxu0 }
 0x99a   :  { %v3248_v26 = vadd.f32 %v2209_v31, %v3131_v46  ;;  %v1530_v48 = vpop.f32.mrb[41].mxu0 }
 0x99b   :  { %v2210_v16 = vpop.f32.mrb[42].mxu0  ;;  %v3255_v21 = vadd.f32 %v1530_v48, %v3129_v58 }
 0x99c   :  { %v3251_v63 = vadd.f32 %v2210_v16, %v3151_v11  ;;  %v1533_v8 = vpop.f32.mrb[43].mxu0  ;;  %1565 = vadd.xlane.f32.xlu0 %v3248_v26  ;;  %v1587_v11 = vmul.f32 %v3248_v26, %v3248_v26 }
 0x99d   :  { %v3259_v10 = vadd.f32 %v1533_v8, %v3118_v49  ;;  %v1585_v49 = vmul.f32 %v3255_v21, %v3255_v21 }
 0x99e   :  { %1567 = vadd.xlane.f32.xlu1 %v3251_v63  ;;  %v1588_v58 = vmul.f32 %v3251_v63, %v3251_v63 }
 0x99f   :  { %v1586_v13 = vmul.f32 %v3259_v10, %v3259_v10 }
 0x9a0   :  { %1561 = vadd.xlane.f32.xlu0 %v3255_v21 }
 0x9a1   :  { %v2213_v6 = vpop.f32.mrb[44].mxu0 }
 0x9a2   :  { %v1546_v46 = vpop.f32.mrb[45].mxu0  ;;  %1563 = vadd.xlane.f32.xlu1 %v3259_v10  ;;  %v3272_v59 = vadd.f32 %v2213_v6, %v3172_v38 }
 0x9a3   :  { %v2214_v53 = vpop.f32.mrb[46].mxu0  ;;  %v3279_v20 = vadd.f32 %v1546_v46, %v3153_v30 }
 0x9a4   :  { %v1549_v55 = vpop.f32.mrb[47].mxu0  ;;  %1597 = vadd.xlane.f32.xlu0 %v1587_v11  ;;  %v3275_v33 = vadd.f32 %v2214_v53, %v3185_v22  ;;  %v1591_v30 = vmul.f32 %v3272_v59, %v3272_v59 }
 0x9a5   :  { %v3283_v17 = vadd.f32 %v1549_v55, %v3170_v39  ;;  %v1589_v38 = vmul.f32 %v3279_v20, %v3279_v20 }
 0x9a6   :  { %1599 = vadd.xlane.f32.xlu1 %v1588_v58  ;;  %v1592_v39 = vmul.f32 %v3275_v33, %v3275_v33 }
 0x9a7   :  { %v1590_v22 = vmul.f32 %v3283_v17, %v3283_v17 }
 0x9a8   :  { %1593 = vadd.xlane.f32.xlu0 %v1585_v49 }
 0x9aa   :  { %1595 = vadd.xlane.f32.xlu1 %v1586_v13 }
 0x9ac   :  { %1573 = vadd.xlane.f32.xlu0 %v3272_v59 }
 0x9ae   :  { %1575 = vadd.xlane.f32.xlu1 %v3275_v33 }
 0x9b0   :  { %1569 = vadd.xlane.f32.xlu0 %v3279_v20 }
 0x9b2   :  { %1571 = vadd.xlane.f32.xlu1 %v3283_v17 }
 0x9b4   :  { %1601 = vadd.xlane.f32.xlu0 %v1589_v38 }
 0x9b6   :  { %1603 = vadd.xlane.f32.xlu1 %v1590_v22 }
 0x9b8   :  { %1605 = vadd.xlane.f32.xlu0 %v1591_v30 }
 0x9ba   :  { %1607 = vadd.xlane.f32.xlu1 %v1592_v39 }
 0x9cb   :  { %1732 = vperm.xlu1 %2219, %v79_v42  }
 0x9ce   :  { %1737 = vperm.xlu0 %2220, %v80_v32  }
 0x9cf   :  { %1742 = vperm.xlu1 %2219, %v81_v54  }
 0x9d2   :  { %1747 = vperm.xlu0 %2220, %v82_v4  }
 0x9d3   :  { %1752 = vperm.xlu1 %2219, %v83_v35  }
 0x9d6   :  { %1757 = vperm.xlu0 %2220, %v84_v15  }
 0xa29   :  { %v1566_v43 = vpop.xlane.xlu0 %1565 }
 0xa2a   :  { %v1579_v41 = vadd.f32 %v1566_v43, %v889_v50 }
 0xa2b   :  { %v1568_v51 = vpop.xlane.xlu1 %1567 }
 0xa2c   :  { %v1580_v12 = vadd.f32 %v1568_v51, %v891_v56  ;;  %v3317_v2 = vmul.f32 0.00390625, %v1579_v41 }
 0xa2d   :  { %v1562_v5 = vpop.xlane.xlu0 %1561 }
 0xa2e   :  { %v1577_v45 = vadd.f32 %v1562_v5, %v885_v62  ;;  %v3319_v24 = vmul.f32 0.00390625, %v1580_v12  ;;  %v1636_v6 = vmul.f32 %v3317_v2, %v3317_v2 }
 0xa2f   :  { %v1564_v18 = vpop.xlane.xlu1 %1563 }
 0xa30   :  { %v1578_v31 = vadd.f32 %v1564_v18, %v887_v0  ;;  %v3321_v16 = vmul.f32 0.00390625, %v1577_v45  ;;  %v1637_v53 = vmul.f32 %v3319_v24, %v3319_v24 }
 0xa31   :  { %v1598_v34 = vpop.xlane.xlu0 %1597 }
 0xa32   :  { %v1611_v48 = vadd.f32 %v1598_v34, %v921_v25  ;;  %v3327_v58 = vmul.f32 0.00390625, %v1578_v31  ;;  %v1634_v22 = vmul.f32 %v3321_v16, %v3321_v16  ;;  %v73_v34 = vld [vmem:[%s3487_s6 + $0x10] sm:$0xff] }
 0xa33   :  { %v1600_v8 = vpop.xlane.xlu1 %1599 }
 0xa34   :  { %v1628_v46 = vmul.f32 0.00390625, %v1611_v48  ;;  %v1612_v11 = vadd.f32 %v1600_v8, %v923_v7  ;;  %v1635_v15 = vmul.f32 %v3327_v58, %v3327_v58 }
 0xa35   :  { %v1594_v55 = vpop.xlane.xlu0 %1593 }
 0xa36   :  { %v1644_v49 = vsub.f32 %v1628_v46, %v1636_v6  ;;  %v1629_v13 = vmul.f32 0.00390625, %v1612_v11  ;;  %v1609_v38 = vadd.f32 %v1594_v55, %v917_v60  ;;  %v71_v55 = vld [vmem:[%s3487_s6] sm:$0xff] }
 0xa37   :  { %v1596_v30 = vpop.xlane.xlu1 %1595 }
 0xa38   :  { %v1652_v39 = vadd.f32 1e-05, %v1644_v49  ;;  %v1645_v42 = vsub.f32 %v1629_v13, %v1637_v53  ;;  %v1626_v32 = vmul.f32 0.00390625, %v1609_v38  ;;  %v1610_v54 = vadd.f32 %v1596_v30, %v919_v3 }
 0xa39   :  { %v1574_v4 = vpop.xlane.xlu0 %1573 }
 0xa3a   :  { %2365 = vrsqrt.f32 %v1652_v39  ;;  %v1642_v35 = vsub.f32 %v1626_v32, %v1634_v22  ;;  %v1627_v0 = vmul.f32 0.00390625, %v1610_v54  ;;  %v1653_v62 = vadd.f32 1e-05, %v1645_v42 }
 0xa3b   :  { %v1576_v50 = vpop.xlane.xlu1 %1575  ;;  %v1583_v41 = vadd.f32 %v1574_v4, %v897_v61 }
 0xa3c   :  { %v1650_v56 = vadd.f32 1e-05, %v1642_v35  ;;  %v1643_v25 = vsub.f32 %v1627_v0, %v1635_v15  ;;  %v1584_v45 = vadd.f32 %v1576_v50, %v899_v28 }
 0xa3d   :  { %v1570_v60 = vpop.xlane.xlu0 %1569  ;;  %v3338_v8 = vmul.f32 0.00390625, %v1583_v41 }
 0xa3e   :  { %2367 = vrsqrt.f32 %v1650_v56  ;;  %v1651_v7 = vadd.f32 1e-05, %v1643_v25  ;;  %v1581_v43 = vadd.f32 %v1570_v60, %v893_v27  ;;  %v3344_v53 = vmul.f32 0.00390625, %v1584_v45 }
 0xa3f   :  { %2369 = vrsqrt.f32 %v1653_v62  ;;  %v1572_v51 = vpop.xlane.xlu1 %1571  ;;  %v1640_v22 = vmul.f32 %v3338_v8, %v3338_v8  ;;  %v74_v62 = vld [vmem:[%s3487_s6 + $0x18] sm:$0xff] }
 0xa40   :  { %2371 = vrsqrt.f32 %v1651_v7  ;;  %v1582_v3 = vadd.f32 %v1572_v51, %v895_v19  ;;  %v3333_v12 = vmul.f32 0.00390625, %v1581_v43  ;;  %v1641_v15 = vmul.f32 %v3344_v53, %v3344_v53  ;;  %v77_v51 = vld [vmem:[%s3487_s6 + $0x30] sm:$0xff] }
 0xa41   :  { %v1602_v5 = vpop.xlane.xlu0 %1601 }
 0xa42   :  { %v1613_v18 = vadd.f32 %v1602_v5, %v925_v37  ;;  %v3340_v6 = vmul.f32 0.00390625, %v1582_v3  ;;  %v1638_v19 = vmul.f32 %v3333_v12, %v3333_v12  ;;  %v78_v3 = vld [vmem:[%s3487_s6 + $0x38] sm:$0xff] }
 0xa43   :  { %v1604_v31 = vpop.xlane.xlu1 %1603 }
 0xa44   :  { %v2366_v48 = vpop.eup %2365  ;;  %v1630_v27 = vmul.f32 0.00390625, %v1613_v18  ;;  %v1614_v46 = vadd.f32 %v1604_v31, %v927_v29  ;;  %v1639_v29 = vmul.f32 %v3340_v6, %v3340_v6 }
 0xa45   :  { %v1606_v61 = vpop.xlane.xlu0 %1605  ;;  %v1668_v11 = vmul.f32 %v2366_v48, %v73_v34  ;;  %v75_v34 = vld [vmem:[%s3487_s6 + $0x20] sm:$0xff] }
 0xa46   :  { %v1631_v28 = vmul.f32 0.00390625, %v1614_v46  ;;  %v1615_v37 = vadd.f32 %v1606_v61, %v3313_v36  ;;  %v1646_v49 = vsub.f32 %v1630_v27, %v1638_v19  ;;  %v72_v36 = vld [vmem:[%s3487_s6 + $0x8] sm:$0xff]  ;;  %v85_v61 = vld [vmem:[%s3488_s7 + $0x30] sm:$0xff] }
 0xa47   :  { %1694 = vperm.xlu1 %2219, %v1668_v11   ;;  %v1608_v13 = vpop.xlane.xlu1 %1607  ;;  %v76_v27 = vld [vmem:[%s3487_s6 + $0x28] sm:$0xff]  ;;  %v86_v11 = vld [vmem:[%s3488_s7 + $0x38] sm:$0xff] }
 0xa48   :  { %v2368_v38 = vpop.eup %2367  ;;  %v1632_v30 = vmul.f32 0.00390625, %v1615_v37  ;;  %v1616_v39 = vadd.f32 %v1608_v13, %v3315_v47  ;;  %v1647_v4 = vsub.f32 %v1631_v28, %v1639_v29  ;;  %v1654_v50 = vadd.f32 1e-05, %v1646_v49 }
 0xa49   :  { %v2370_v42 = vpop.eup %2369  ;;  %v1666_v32 = vmul.f32 %v2368_v38, %v71_v55  ;;  %v1676_v38 = vsub.f32 %v3140_v14, %v3317_v2  ;;  %v1804_v29 = vsub.f32 %v3248_v26, %v3317_v2  ;;  %v1675_v26 = vsub.f32 %v3122_v57, %v3327_v58 }
 0xa4a   :  { %v2372_v54 = vpop.eup %2371  ;;  %v1648_v35 = vsub.f32 %v1632_v30, %v1640_v22  ;;  %v1633_v0 = vmul.f32 0.00390625, %v1616_v39  ;;  %v1669_v60 = vmul.f32 %v2370_v42, %v74_v62  ;;  %v1655_v7 = vadd.f32 1e-05, %v1647_v4 }
 0xa4b   :  { %1684 = vperm.xlu0 %2220, %v1666_v32   ;;  %v1667_v47 = vmul.f32 %v2372_v54, %v72_v36  ;;  %v1733_v28 = vpop.permute.xlu1 %1732  ;;  %v1674_v54 = vsub.f32 %v3136_v40, %v3321_v16  ;;  %v1802_v4 = vsub.f32 %v3255_v21, %v3321_v16  ;;  %v1803_v2 = vsub.f32 %v3259_v10, %v3327_v58  ;;  %v2381_v21 = vld [vmem:[%s3481_s0 + $0x10] sm:$0xff] }
 0xa4c   :  { %v1656_v56 = vadd.f32 1e-05, %v1648_v35  ;;  %v1649_v25 = vsub.f32 %v1633_v0, %v1641_v15  ;;  %v1805_v40 = vsub.f32 %v3251_v63, %v3319_v24 }
 0xa4d   :  { %1689 = vperm.xlu1 %2219, %v1667_v47   ;;  %v1738_v37 = vpop.permute.xlu0 %1737  ;;  %v1677_v47 = vsub.f32 %v3158_v1, %v3319_v24 }
 0xa4e   :  { %2373 = vrsqrt.f32 %v1656_v56  ;;  %v1657_v43 = vadd.f32 1e-05, %v1649_v25  ;;  %v2382_v56 = vld [vmem:[%s3481_s0 + $0x50] sm:$0xff] }
 0xa4f   :  { %2375 = vrsqrt.f32 %v1654_v50  ;;  %1699 = vperm.xlu0 %2220, %v1669_v60   ;;  %v1743_v55 = vpop.permute.xlu1 %1742 }
 0xa50   :  { %2377 = vrsqrt.f32 %v1657_v43 }
 0xa51   :  { %2379 = vrsqrt.f32 %v1655_v7  ;;  %v1748_v49 = vpop.permute.xlu0 %1747 }
 0xa53   :  { %v3381_v13 = vpop.permute.xlu1 %1752 }
 0xa55   :  { %v3387_v22 = vpop.permute.xlu0 %1757 }
 0xa58   :  { %v2374_v41 = vpop.eup %2373 }
 0xa59   :  { %v2376_v5 = vpop.eup %2375  ;;  %v1672_v45 = vmul.f32 %v2374_v41, %v77_v51 }
 0xa5a   :  { %v2378_v18 = vpop.eup %2377  ;;  %v1670_v46 = vmul.f32 %v2376_v5, %v75_v34 }
 0xa5b   :  { %1714 = vperm.xlu1 %2219, %v1672_v45   ;;  %v1673_v31 = vmul.f32 %v2378_v18, %v78_v3  ;;  %v2380_v48 = vpop.eup %2379  ;;  %v2383_v3 = vld [vmem:[%s3481_s0] sm:$0xff] }
 0xa5c   :  { %v1671_v19 = vmul.f32 %v2380_v48, %v76_v27  ;;  %v2384_v45 = vld [vmem:[%s3481_s0 + $0x40] sm:$0xff] }
 0xa5d   :  { %1719 = vperm.xlu0 %2220, %v1673_v31  }
 0xa5f   :  { %1704 = vperm.xlu1 %2219, %v1670_v46  }
 0xa61   :  { %1709 = vperm.xlu0 %2220, %v1671_v19  }
 0xa63   :  { %1762 = vperm.xlu1 %2219, %v85_v61   ;;  %v2385_v61 = vld [vmem:[%s3481_s0 + $0x8] sm:$0xff] }
 0xa65   :  { %1767 = vperm.xlu0 %2220, %v86_v11  }
 0xac6   :  { %v1695_v30 = vpop.permute.xlu1 %1694 }
 0xac7   :  { %v1724_v39 = vmul.f32 %v1695_v30, %v1676_v38  ;;  %v1812_v36 = vmul.f32 %v1804_v29, %v1695_v30  ;;  %v2388_v38 = vld [vmem:[%s3481_s0 + $0x58] sm:$0xff] }
 0xac9   :  { %v1772_v42 = vadd.f32 %v1743_v55, %v1724_v39  ;;  %v1820_v32 = vadd.f32 %v1812_v36, %v1743_v55  ;;  %v2387_v55 = vld [vmem:[%s3481_s0 + $0x18] sm:$0xff]  ;;  %v1678_v36 = vsub.f32 %v3162_v44, %v3333_v12 }
 0xaca   :  { %v1685_v35 = vpop.permute.xlu0 %1684 }
 0xacb   :  { %v1780_v15 = vmax.f32 %v1772_v42, 0.0  ;;  %v1828_v0 = vmax.f32 %v1820_v32, 0.0  ;;  %v1722_v14 = vmul.f32 %v1685_v35, %v1674_v54  ;;  %v1810_v62 = vmul.f32 %v1802_v4, %v1685_v35 }
 0xacc   :  { %v1690_v50 = vpop.permute.xlu1 %1689  ;;  %v1806_v42 = vsub.f32 %v3279_v20, %v3333_v12  ;;  %v1679_v35 = vsub.f32 %v3177_v9, %v3340_v6  ;;  %v1681_v9 = vsub.f32 %v3189_v23, %v3344_v53 }
 0xacd   :  { %v1788_v16 = vadd.f32 %v2381_v21, %v1780_v15  ;;  %v1836_v57 = vadd.f32 %v2382_v56, %v1828_v0  ;;  %v1770_v25 = vadd.f32 %v1733_v28, %v1722_v14  ;;  %v1818_v60 = vadd.f32 %v1810_v62, %v1733_v28  ;;  %v2386_v28 = vld [vmem:[%s3481_s0 + $0x48] sm:$0xff] }
 0xace   :  { %v1723_v10 = vmul.f32 %v1690_v50, %v1675_v26  ;;  %v1811_v58 = vmul.f32 %v1803_v2, %v1690_v50  ;;  %v1700_v7 = vpop.permute.xlu0 %1699  ;;  %v1807_v15 = vsub.f32 %v3283_v17, %v3340_v6  ;;  %v1680_v0 = vsub.f32 %v3181_v52, %v3338_v8 }
 0xacf   :  { %1796 = vst [vmem:[#allocation2 + $0x10] sm:$0xff] %v1788_v16  ;;  %1845 = vst [vmem:[#allocation2 + $0x50] sm:$0xff] %v1836_v57  ;;  %v1778_v1 = vmax.f32 %v1770_v25, 0.0  ;;  %v1826_v43 = vmax.f32 %v1818_v60, 0.0  ;;  %v1725_v63 = vmul.f32 %v1700_v7, %v1677_v47  ;;  %v1813_v24 = vmul.f32 %v1805_v40, %v1700_v7  ;;  %v2389_v57 = vld [vmem:[%s3481_s0 + $0x20] sm:$0xff] }
 0xad0   :  { %v1771_v51 = vadd.f32 %v1738_v37, %v1723_v10  ;;  %v1819_v41 = vadd.f32 %v1811_v58, %v1738_v37  ;;  %v1808_v14 = vsub.f32 %v3272_v59, %v3338_v8  ;;  %v1809_v17 = vsub.f32 %v3275_v33, %v3344_v53  ;;  %v2390_v33 = vld [vmem:[%s3481_s0 + $0x60] sm:$0xff] }
 0xad1   :  { %v1786_v5 = vadd.f32 %v2383_v3, %v1778_v1  ;;  %v1834_v18 = vadd.f32 %v2384_v45, %v1826_v43  ;;  %v1773_v34 = vadd.f32 %v1748_v49, %v1725_v63  ;;  %v1821_v31 = vadd.f32 %v1813_v24, %v1748_v49  ;;  %v2391_v1 = vld [vmem:[%s3481_s0 + $0x28] sm:$0xff]  ;;  %v2394_v3 = vld [vmem:[%s3481_s0 + $0x70] sm:$0xff] }
 0xad2   :  { %v1779_v48 = vmax.f32 %v1771_v51, 0.0  ;;  %v1827_v27 = vmax.f32 %v1819_v41, 0.0  ;;  %v2392_v63 = vld [vmem:[%s3481_s0 + $0x68] sm:$0xff]  ;;  %v2393_v51 = vld [vmem:[%s3481_s0 + $0x30] sm:$0xff] }
 0xad3   :  { %1794 = vst [vmem:[#allocation2] sm:$0xff] %v1786_v5  ;;  %1843 = vst [vmem:[#allocation2 + $0x40] sm:$0xff] %v1834_v18  ;;  %v1781_v46 = vmax.f32 %v1773_v34, 0.0  ;;  %v1829_v19 = vmax.f32 %v1821_v31, 0.0  ;;  %v2395_v34 = vld [vmem:[%s3481_s0 + $0x38] sm:$0xff] }
 0xad4   :  { %v1787_v11 = vadd.f32 %v2385_v61, %v1779_v48  ;;  %v1835_v37 = vadd.f32 %v2386_v28, %v1827_v27  ;;  %v2396_v48 = vld [vmem:[%s3481_s0 + $0x78] sm:$0xff] }
 0xad5   :  { %v1789_v49 = vadd.f32 %v2387_v55, %v1781_v46  ;;  %v1837_v29 = vadd.f32 %v2388_v38, %v1829_v19 }
 0xad6   :  { %1795 = vst [vmem:[#allocation2 + $0x8] sm:$0xff] %v1787_v11  ;;  %1844 = vst [vmem:[#allocation2 + $0x48] sm:$0xff] %v1835_v37 }
 0xad7   :  { %1797 = vst [vmem:[#allocation2 + $0x18] sm:$0xff] %v1789_v49  ;;  %1846 = vst [vmem:[#allocation2 + $0x58] sm:$0xff] %v1837_v29 }
 0xada   :  { %v1715_v30 = vpop.permute.xlu1 %1714 }
 0xadb   :  { %v1728_v2 = vmul.f32 %v1715_v30, %v1680_v0  ;;  %v1816_v50 = vmul.f32 %v1808_v14, %v1715_v30 }
 0xadc   :  { %v1720_v39 = vpop.permute.xlu0 %1719 }
 0xadd   :  { %v1729_v40 = vmul.f32 %v1720_v39, %v1681_v9  ;;  %v1817_v21 = vmul.f32 %v1809_v17, %v1720_v39 }
 0xade   :  { %v1705_v32 = vpop.permute.xlu1 %1704 }
 0xadf   :  { %v1726_v54 = vmul.f32 %v1705_v32, %v1678_v36  ;;  %v1814_v4 = vmul.f32 %v1806_v42, %v1705_v32 }
 0xae0   :  { %v1710_v62 = vpop.permute.xlu0 %1709 }
 0xae1   :  { %v1774_v44 = vadd.f32 %v3381_v13, %v1726_v54  ;;  %v1822_v20 = vadd.f32 %v1814_v4, %v3381_v13  ;;  %v1727_v12 = vmul.f32 %v1710_v62, %v1679_v35  ;;  %v1815_v26 = vmul.f32 %v1807_v15, %v1710_v62 }
 0xae2   :  { %v1763_v6 = vpop.permute.xlu1 %1762 }
 0xae3   :  { %v1782_v52 = vmax.f32 %v1774_v44, 0.0  ;;  %v1830_v47 = vmax.f32 %v1822_v20, 0.0  ;;  %v1775_v59 = vadd.f32 %v3387_v22, %v1727_v12  ;;  %v1823_v8 = vadd.f32 %v1815_v26, %v3387_v22 }
 0xae4   :  { %v1776_v13 = vadd.f32 %v1763_v6, %v1728_v2  ;;  %v1824_v16 = vadd.f32 %v1816_v50, %v1763_v6  ;;  %v1768_v56 = vpop.permute.xlu0 %1767 }
 0xae5   :  { %v1790_v23 = vadd.f32 %v2389_v57, %v1782_v52  ;;  %v1838_v53 = vadd.f32 %v2390_v33, %v1830_v47  ;;  %v1783_v25 = vmax.f32 %v1775_v59, 0.0  ;;  %v1831_v60 = vmax.f32 %v1823_v8, 0.0 }
 0xae6   :  { %v1784_v10 = vmax.f32 %v1776_v13, 0.0  ;;  %v1832_v58 = vmax.f32 %v1824_v16, 0.0  ;;  %v1777_v22 = vadd.f32 %v1768_v56, %v1729_v40  ;;  %v1825_v7 = vadd.f32 %v1817_v21, %v1768_v56 }
 0xae7   :  { %1798 = vst [vmem:[#allocation2 + $0x20] sm:$0xff] %v1790_v23  ;;  %1847 = vst [vmem:[#allocation2 + $0x60] sm:$0xff] %v1838_v53  ;;  %v1791_v43 = vadd.f32 %v2391_v1, %v1783_v25  ;;  %v1839_v24 = vadd.f32 %v2392_v63, %v1831_v60 }
 0xae8   :  { %v1792_v41 = vadd.f32 %v2393_v51, %v1784_v10  ;;  %v1840_v5 = vadd.f32 %v2394_v3, %v1832_v58  ;;  %v1785_v45 = vmax.f32 %v1777_v22, 0.0  ;;  %v1833_v18 = vmax.f32 %v1825_v7, 0.0 }
 0xae9   :  { %1799 = vst [vmem:[#allocation2 + $0x28] sm:$0xff] %v1791_v43  ;;  %1848 = vst [vmem:[#allocation2 + $0x68] sm:$0xff] %v1839_v24 }
 0xaea   :  { %1800 = vst [vmem:[#allocation2 + $0x30] sm:$0xff] %v1792_v41  ;;  %1849 = vst [vmem:[#allocation2 + $0x70] sm:$0xff] %v1840_v5  ;;  %v1793_v31 = vadd.f32 %v2395_v34, %v1785_v45  ;;  %v1841_v27 = vadd.f32 %v2396_v48, %v1833_v18 }
 0xaec   :  { %1801 = vst [vmem:[#allocation2 + $0x38] sm:$0xff] %v1793_v31  ;;  %1850 = vst [vmem:[#allocation2 + $0x78] sm:$0xff] %v1841_v27 }
 0xaed   :  { %2408 = shalt.err (!%p2405_p4)
}
 0xaee   :  { %s2409_s4 = scalar_lea.hbm %s3489_s8, 2048 }
 0xaef   :  { %p2410_p5 = scmp.ne.s32.totalorder %s3489_s8, %s2409_s4  ;;  %p2413_p6 = scmp.lt.u32.totalorder %s2409_s4, %s3489_s8 }
 0xaf1   :  { %p2415_p7 = pnand %p2413_p6, %p2410_p5 }
 0xaf3   :  { %2418 = shalt.err (!%p2415_p7)
}
 0xaf4   :  { %s2423_s29 = smov 128   ;;  %s2424_s30 = smov 8  }
 0xaf5   :  { %1862 = dma.vmem_to_hbm [thread:$0]  %s1857_s18, 2048, %s3489_s8, [#allocation3], %s2423_s29, %s2423_s29, %s2424_s30  }
 0xaf6   :  { %2419 = dma.done.wait [#allocation3], 2048  }
 0xaf7   :  { %2420 = vsyncadd [#allocation3], 4294965248 }
 0xaf8   :  { %1866 = vsyncpa [#allocation3], 1 }

</bundles_post_ra>
